<compile_context>
chip_gen: v7x
topology: tpu7x:2x2x1
jax: 0.10.0
libtpu: 0.0.40
codegen_flags: <defaults>
</compile_context>

<pallas_src>
import math
import jax
import jax.numpy as jnp
from jax.experimental import pallas as pl
from jax.experimental.pallas import tpu as pltpu


def _round_up(x: int, m: int) -> int:
    return ((x + m - 1) // m) * m


def _vmem_capacity_bytes() -> int:
    """Best-effort VMEM capacity query; conservative (v7x-sized) fallback."""
    try:
        info = pltpu.get_tpu_info()
        return int(getattr(info, "vmem_capacity_bytes", 64 * 1024 * 1024))
    except Exception:
        return 64 * 1024 * 1024


def mlp_kernel(x_ref,
               w1_ref, b1_ref,
               w2_ref, b2_ref,
               w3_ref, b3_ref,
               w4_ref, b4_ref,
               w5_ref, b5_ref,
               o_ref):
    # Transposed formulation: activations are (features, batch_tile).  The
    # batch sits on the lane axis, so the final store is lane-dense.
    x = x_ref[...]                                               # bf16 (5, tm)

    h = jnp.dot(w1_ref[...], x, preferred_element_type=jnp.float32)
    h = jnp.maximum(h + b1_ref[...], 0.0)                        # f32 (128, tm)

    h = jnp.dot(w2_ref[...], h.astype(jnp.bfloat16),
                preferred_element_type=jnp.float32)
    h = jnp.maximum(h + b2_ref[...], 0.0)                        # f32 (512, tm)

    h = jnp.dot(w3_ref[...], h.astype(jnp.bfloat16),
                preferred_element_type=jnp.float32)
    h = jnp.maximum(h + b3_ref[...], 0.0)                        # f32 (256, tm)

    h = jnp.dot(w4_ref[...], h.astype(jnp.bfloat16),
                preferred_element_type=jnp.float32)
    h = jnp.maximum(h + b4_ref[...], 0.0)                        # f32 (64, tm)

    # Final layer (64 -> 1) as VPU multiply + XLU sublane reduction.
    # w5_ref is a (64, 1) f32 column; the result is a lane-dense (1, tm) row.
    out = jnp.sum(h * w5_ref[...], axis=0, keepdims=True) + b5_ref[...]
    o_ref[...] = out.astype(o_ref.dtype)                         # f32 (1, tm)


def mlp_forward(x, params, *, tm=None, vmem_limit_bytes=None):
    """x: (N, 5) float32.  params: list of (W, b) in PyTorch layout:
    W (out_features, in_features), b (out_features,).

    Returns (N, 1) float32 (bf16 matmul operands, f32 accumulation)."""
    N, D_in = x.shape
    assert D_in == 5

    (w1, b1), (w2, b2), (w3, b3), (w4, b4), (w5, b5) = params

    # --- chip-dependent tiling / VMEM budget --------------------------------
    vmem_cap = _vmem_capacity_bytes()
    big_vmem = vmem_cap >= 100 * 1024 * 1024     # v5e/v6e: 128 MiB, single TC
    if tm is None:
        tm = 8192 if big_vmem else 4096
    if vmem_limit_bytes is None:
        vmem_limit_bytes = (96 if big_vmem else 48) * 1024 * 1024

    # Tile is a multiple of 256 (MXU-friendly, lane-aligned).
    n_min = _round_up(N, 256)
    tm_eff = min(tm, n_min)
    if (not big_vmem) and n_min >= 512:
        # v7x-like (2 TensorCores): keep >=2 grid steps on the ("parallel",)
        # axis so both cores get a share.  Disabled on single-TC chips.
        tm_eff = min(tm_eff, _round_up(pl.cdiv(n_min, 2), 256))
    n_pad = _round_up(N, tm_eff)
    grid = (n_pad // tm_eff,)

    # Transposed + padded + bf16 input in one small fused XLA pass.
    x_t = jnp.pad(x.astype(jnp.bfloat16).T, ((0, 0), (0, n_pad - N)))  # (5, n_pad)

    def col(b):
        return jnp.asarray(b, jnp.float32).reshape(-1, 1)

    weight_args = (
        w1.astype(jnp.bfloat16), col(b1),
        w2.astype(jnp.bfloat16), col(b2),
        w3.astype(jnp.bfloat16), col(b3),
        w4.astype(jnp.bfloat16), col(b4),
        jnp.asarray(w5, jnp.float32).reshape(-1, 1),     # (64, 1)
        jnp.asarray(b5, jnp.float32).reshape(1, 1),      # (1, 1)
    )

    def const_spec(a):
        return pl.BlockSpec(a.shape, lambda i: (0, 0))

    in_specs = [pl.BlockSpec((D_in, tm_eff), lambda i: (0, i))]
    in_specs += [const_spec(a) for a in weight_args]
    out_spec = pl.BlockSpec((1, tm_eff), lambda i: (0, i))     # lane-dense store

    out = pl.pallas_call(
        mlp_kernel,
        out_shape=jax.ShapeDtypeStruct((1, n_pad), jnp.float32),
        grid_spec=pltpu.PrefetchScalarGridSpec(
            num_scalar_prefetch=0,
            grid=grid,
            in_specs=in_specs,
            out_specs=out_spec,
        ),
        compiler_params=pltpu.CompilerParams(
            dimension_semantics=("parallel",),
            # Budget: bf16 weights ~0.45 MB (x2 buffers), x/out tiles tiny,
            # widest live intermediates ~20 MB at tm=4096 / ~40 MB at tm=8192.
            vmem_limit_bytes=vmem_limit_bytes,
        ),
    )(x_t, *weight_args)

    return out.reshape(n_pad, 1)[:N]


def init_params(key):
    """Deterministic init mimicking PyTorch's default nn.Linear init:
    U(-1/sqrt(fan_in), 1/sqrt(fan_in)) for both weight and bias.
    Weights in PyTorch layout (out_features, in_features)."""
    dims = [(5, 128), (128, 512), (512, 256), (256, 64), (64, 1)]
    params = []
    for (fan_in, fan_out) in dims:
        key, kw, kb = jax.random.split(key, 3)
        bound = 1.0 / math.sqrt(fan_in)
        w = jax.random.uniform(kw, (fan_out, fan_in), jnp.float32, -bound, bound)
        b = jax.random.uniform(kb, (fan_out,), jnp.float32, -bound, bound)
        params.append((w, b))
    return params


def reference_forward(x, params):
    """Pure-JAX reference mirroring the kernel's bf16-operand / f32-accumulate
    arithmetic (same casts, same f32 final reduction layer)."""
    (w1, b1), (w2, b2), (w3, b3), (w4, b4), (w5, b5) = params
    h = x
    for (w, b) in ((w1, b1), (w2, b2), (w3, b3), (w4, b4)):
        h = jnp.dot(h.astype(jnp.bfloat16), w.T.astype(jnp.bfloat16),
                    preferred_element_type=jnp.float32)
        h = jnp.maximum(h + b.reshape(1, -1).astype(jnp.float32), 0.0)
    return (jnp.sum(h * jnp.asarray(w5, jnp.float32).reshape(1, -1),
                    axis=-1, keepdims=True)
            + jnp.asarray(b5, jnp.float32).reshape(1, 1))


if __name__ == "__main__":
    key = jax.random.PRNGKey(0)
    key, kx = jax.random.split(key)

    # Deliberately not a multiple of the tile: exercises padding + tiling.
    N = 300
    x = jax.random.normal(kx, (N, 5), jnp.float32)

    params = init_params(key)

    out = jax.block_until_ready(mlp_forward(x, params))
    ref = reference_forward(x, params)

    assert out.shape == (N, 1)
    assert jnp.allclose(out, ref, atol=2e-3, rtol=2e-3), "mismatch vs reference"

    print("KERNEL_OK")
</pallas_src>

<mosaic_0001>
module attributes {stable_mosaic.version = 11 : i64} {
  func.func @mlp_kernel(%arg0: i32, %arg1: memref<5x256xbf16, #tpu.memory_space<vmem>>, %arg2: memref<128x5xbf16, #tpu.memory_space<vmem>>, %arg3: memref<128x1xf32, #tpu.memory_space<vmem>>, %arg4: memref<512x128xbf16, #tpu.memory_space<vmem>>, %arg5: memref<512x1xf32, #tpu.memory_space<vmem>>, %arg6: memref<256x512xbf16, #tpu.memory_space<vmem>>, %arg7: memref<256x1xf32, #tpu.memory_space<vmem>>, %arg8: memref<64x256xbf16, #tpu.memory_space<vmem>>, %arg9: memref<64x1xf32, #tpu.memory_space<vmem>>, %arg10: memref<64x1xf32, #tpu.memory_space<vmem>>, %arg11: memref<1x1xf32, #tpu.memory_space<vmem>>, %arg12: memref<1x256xf32, #tpu.memory_space<vmem>>) attributes {dimension_semantics = [#tpu.dimension_semantics<parallel>], iteration_bounds = array<i64: 2>, scalar_prefetch = 0 : i64, scratch_operands = 0 : i64, tpu.core_type = #tpu.core_type<tc>, window_params = [{transform_indices = @transform_0, window_bounds = array<i64: 5, 256>}, {pipeline_mode = #tpu.pipeline_mode<synchronous>, transform_indices = @transform_1, window_bounds = array<i64: 128, 5>}, {pipeline_mode = #tpu.pipeline_mode<synchronous>, transform_indices = @transform_2, window_bounds = array<i64: 128, 1>}, {pipeline_mode = #tpu.pipeline_mode<synchronous>, transform_indices = @transform_3, window_bounds = array<i64: 512, 128>}, {pipeline_mode = #tpu.pipeline_mode<synchronous>, transform_indices = @transform_4, window_bounds = array<i64: 512, 1>}, {pipeline_mode = #tpu.pipeline_mode<synchronous>, transform_indices = @transform_5, window_bounds = array<i64: 256, 512>}, {pipeline_mode = #tpu.pipeline_mode<synchronous>, transform_indices = @transform_6, window_bounds = array<i64: 256, 1>}, {pipeline_mode = #tpu.pipeline_mode<synchronous>, transform_indices = @transform_7, window_bounds = array<i64: 64, 256>}, {pipeline_mode = #tpu.pipeline_mode<synchronous>, transform_indices = @transform_8, window_bounds = array<i64: 64, 1>}, {pipeline_mode = #tpu.pipeline_mode<synchronous>, transform_indices = @transform_9, window_bounds = array<i64: 64, 1>}, {pipeline_mode = #tpu.pipeline_mode<synchronous>, transform_indices = @transform_10, window_bounds = array<i64: 1, 1>}, {transform_indices = @transform_11, window_bounds = array<i64: 1, 256>}]} {
    %c0 = arith.constant 0 : index
    %c0_0 = arith.constant 0 : index
    %0 = vector.load %arg1[%c0, %c0_0] : memref<5x256xbf16, #tpu.memory_space<vmem>>, vector<5x256xbf16>
    %c0_1 = arith.constant 0 : index
    %c0_2 = arith.constant 0 : index
    %1 = vector.load %arg2[%c0_1, %c0_2] : memref<128x5xbf16, #tpu.memory_space<vmem>>, vector<128x5xbf16>
    %cst = arith.constant dense<0.000000e+00> : vector<128x256xf32>
    %2 = tpu.matmul %1, %0, %cst {dimension_numbers = #tpu.dot_dimension_numbers<[1], [0], [0], [1], [0, 0, 1, 1], [], []>} : vector<128x5xbf16>, vector<5x256xbf16>, vector<128x256xf32> -> vector<128x256xf32>
    %c0_3 = arith.constant 0 : index
    %c0_4 = arith.constant 0 : index
    %3 = vector.load %arg3[%c0_3, %c0_4] : memref<128x1xf32, #tpu.memory_space<vmem>>, vector<128x1xf32>
    %4 = vector.broadcast %3 : vector<128x1xf32> to vector<128x256xf32>
    %5 = arith.addf %2, %4 : vector<128x256xf32>
    %cst_5 = arith.constant 0.000000e+00 : f32
    %6 = vector.broadcast %cst_5 : f32 to vector<128x256xf32>
    %7 = arith.maximumf %5, %6 : vector<128x256xf32>
    %c0_6 = arith.constant 0 : index
    %c0_7 = arith.constant 0 : index
    %8 = vector.load %arg4[%c0_6, %c0_7] : memref<512x128xbf16, #tpu.memory_space<vmem>>, vector<512x128xbf16>
    %9 = arith.truncf %7 : vector<128x256xf32> to vector<128x256xbf16>
    %cst_8 = arith.constant dense<0.000000e+00> : vector<512x256xf32>
    %10 = tpu.matmul %8, %9, %cst_8 {dimension_numbers = #tpu.dot_dimension_numbers<[1], [0], [0], [1], [0, 0, 1, 1], [], []>} : vector<512x128xbf16>, vector<128x256xbf16>, vector<512x256xf32> -> vector<512x256xf32>
    %c0_9 = arith.constant 0 : index
    %c0_10 = arith.constant 0 : index
    %11 = vector.load %arg5[%c0_9, %c0_10] : memref<512x1xf32, #tpu.memory_space<vmem>>, vector<512x1xf32>
    %12 = vector.broadcast %11 : vector<512x1xf32> to vector<512x256xf32>
    %13 = arith.addf %10, %12 : vector<512x256xf32>
    %cst_11 = arith.constant 0.000000e+00 : f32
    %14 = vector.broadcast %cst_11 : f32 to vector<512x256xf32>
    %15 = arith.maximumf %13, %14 : vector<512x256xf32>
    %c0_12 = arith.constant 0 : index
    %c0_13 = arith.constant 0 : index
    %16 = vector.load %arg6[%c0_12, %c0_13] : memref<256x512xbf16, #tpu.memory_space<vmem>>, vector<256x512xbf16>
    %17 = arith.truncf %15 : vector<512x256xf32> to vector<512x256xbf16>
    %cst_14 = arith.constant dense<0.000000e+00> : vector<256x256xf32>
    %18 = tpu.matmul %16, %17, %cst_14 {dimension_numbers = #tpu.dot_dimension_numbers<[1], [0], [0], [1], [0, 0, 1, 1], [], []>} : vector<256x512xbf16>, vector<512x256xbf16>, vector<256x256xf32> -> vector<256x256xf32>
    %c0_15 = arith.constant 0 : index
    %c0_16 = arith.constant 0 : index
    %19 = vector.load %arg7[%c0_15, %c0_16] : memref<256x1xf32, #tpu.memory_space<vmem>>, vector<256x1xf32>
    %20 = vector.broadcast %19 : vector<256x1xf32> to vector<256x256xf32>
    %21 = arith.addf %18, %20 : vector<256x256xf32>
    %cst_17 = arith.constant 0.000000e+00 : f32
    %22 = vector.broadcast %cst_17 : f32 to vector<256x256xf32>
    %23 = arith.maximumf %21, %22 : vector<256x256xf32>
    %c0_18 = arith.constant 0 : index
    %c0_19 = arith.constant 0 : index
    %24 = vector.load %arg8[%c0_18, %c0_19] : memref<64x256xbf16, #tpu.memory_space<vmem>>, vector<64x256xbf16>
    %25 = arith.truncf %23 : vector<256x256xf32> to vector<256x256xbf16>
    %cst_20 = arith.constant dense<0.000000e+00> : vector<64x256xf32>
    %26 = tpu.matmul %24, %25, %cst_20 {dimension_numbers = #tpu.dot_dimension_numbers<[1], [0], [0], [1], [0, 0, 1, 1], [], []>} : vector<64x256xbf16>, vector<256x256xbf16>, vector<64x256xf32> -> vector<64x256xf32>
    %c0_21 = arith.constant 0 : index
    %c0_22 = arith.constant 0 : index
    %27 = vector.load %arg9[%c0_21, %c0_22] : memref<64x1xf32, #tpu.memory_space<vmem>>, vector<64x1xf32>
    %28 = vector.broadcast %27 : vector<64x1xf32> to vector<64x256xf32>
    %29 = arith.addf %26, %28 : vector<64x256xf32>
    %cst_23 = arith.constant 0.000000e+00 : f32
    %30 = vector.broadcast %cst_23 : f32 to vector<64x256xf32>
    %31 = arith.maximumf %29, %30 : vector<64x256xf32>
    %c0_24 = arith.constant 0 : index
    %c0_25 = arith.constant 0 : index
    %32 = vector.load %arg10[%c0_24, %c0_25] : memref<64x1xf32, #tpu.memory_space<vmem>>, vector<64x1xf32>
    %33 = vector.broadcast %32 : vector<64x1xf32> to vector<64x256xf32>
    %34 = arith.mulf %31, %33 : vector<64x256xf32>
    %cst_26 = arith.constant dense<0.000000e+00> : vector<256xf32>
    %35 = vector.multi_reduction <add>, %34, %cst_26 [0] : vector<64x256xf32> to vector<256xf32>
    %36 = vector.shape_cast %35 : vector<256xf32> to vector<1x256xf32>
    %c0_27 = arith.constant 0 : index
    %c0_28 = arith.constant 0 : index
    %37 = vector.load %arg11[%c0_27, %c0_28] : memref<1x1xf32, #tpu.memory_space<vmem>>, vector<1x1xf32>
    %38 = vector.broadcast %37 : vector<1x1xf32> to vector<1x256xf32>
    %39 = arith.addf %36, %38 : vector<1x256xf32>
    %c0_29 = arith.constant 0 : index
    %c0_30 = arith.constant 0 : index
    %40 = vector.load %arg12[%c0_29, %c0_30] : memref<1x256xf32, #tpu.memory_space<vmem>>, vector<1x256xf32>
    tpu.vector_store %arg12[%c0_29, %c0_30], %39 {strides = array<i32>} : memref<1x256xf32, #tpu.memory_space<vmem>>, vector<1x256xf32>,
    return
  }
  func.func @transform_0(%arg0: i32) -> (i32, i32) {
    %c0_i32 = arith.constant 0 : i32
    %c0_i32_0 = arith.constant 0 : i32
    return %c0_i32, %arg0 : i32, i32
  }
  func.func @transform_1(%arg0: i32) -> (i32, i32) {
    %c0_i32 = arith.constant 0 : i32
    %c0_i32_0 = arith.constant 0 : i32
    %c0_i32_1 = arith.constant 0 : i32
    return %c0_i32, %c0_i32_0 : i32, i32
  }
  func.func @transform_2(%arg0: i32) -> (i32, i32) {
    %c0_i32 = arith.constant 0 : i32
    %c0_i32_0 = arith.constant 0 : i32
    %c0_i32_1 = arith.constant 0 : i32
    return %c0_i32, %c0_i32_0 : i32, i32
  }
  func.func @transform_3(%arg0: i32) -> (i32, i32) {
    %c0_i32 = arith.constant 0 : i32
    %c0_i32_0 = arith.constant 0 : i32
    %c0_i32_1 = arith.constant 0 : i32
    return %c0_i32, %c0_i32_0 : i32, i32
  }
  func.func @transform_4(%arg0: i32) -> (i32, i32) {
    %c0_i32 = arith.constant 0 : i32
    %c0_i32_0 = arith.constant 0 : i32
    %c0_i32_1 = arith.constant 0 : i32
    return %c0_i32, %c0_i32_0 : i32, i32
  }
  func.func @transform_5(%arg0: i32) -> (i32, i32) {
    %c0_i32 = arith.constant 0 : i32
    %c0_i32_0 = arith.constant 0 : i32
    %c0_i32_1 = arith.constant 0 : i32
    return %c0_i32, %c0_i32_0 : i32, i32
  }
  func.func @transform_6(%arg0: i32) -> (i32, i32) {
    %c0_i32 = arith.constant 0 : i32
    %c0_i32_0 = arith.constant 0 : i32
    %c0_i32_1 = arith.constant 0 : i32
    return %c0_i32, %c0_i32_0 : i32, i32
  }
  func.func @transform_7(%arg0: i32) -> (i32, i32) {
    %c0_i32 = arith.constant 0 : i32
    %c0_i32_0 = arith.constant 0 : i32
    %c0_i32_1 = arith.constant 0 : i32
    return %c0_i32, %c0_i32_0 : i32, i32
  }
  func.func @transform_8(%arg0: i32) -> (i32, i32) {
    %c0_i32 = arith.constant 0 : i32
    %c0_i32_0 = arith.constant 0 : i32
    %c0_i32_1 = arith.constant 0 : i32
    return %c0_i32, %c0_i32_0 : i32, i32
  }
  func.func @transform_9(%arg0: i32) -> (i32, i32) {
    %c0_i32 = arith.constant 0 : i32
    %c0_i32_0 = arith.constant 0 : i32
    %c0_i32_1 = arith.constant 0 : i32
    return %c0_i32, %c0_i32_0 : i32, i32
  }
  func.func @transform_10(%arg0: i32) -> (i32, i32) {
    %c0_i32 = arith.constant 0 : i32
    %c0_i32_0 = arith.constant 0 : i32
    %c0_i32_1 = arith.constant 0 : i32
    return %c0_i32, %c0_i32_0 : i32, i32
  }
  func.func @transform_11(%arg0: i32) -> (i32, i32) {
    %c0_i32 = arith.constant 0 : i32
    %c0_i32_0 = arith.constant 0 : i32
    return %c0_i32, %arg0 : i32, i32
  }
}

</mosaic_0001>

<bundles_post_ra>
// kernel: tpu_custom_call.1
= control target key start
LH: loop header
LB: loop body
LE: loop exit
PB: predicated region body
PF: predicated region fallthrough
CT: control target
= control target key end

     0   :  { %s4953_s0 = inlined_call_operand.vmem [shape: bf16[5,512], index: 0, kind: input, shape index: {}]   ;;  %s4954_s1 = inlined_call_operand.vmem [shape: bf16[128,5], index: 1, kind: input, shape index: {}]   ;;  %s4955_s2 = inlined_call_operand.vmem [shape: f32[128,1], index: 2, kind: input, shape index: {}]   ;;  %s4956_s3 = inlined_call_operand.vmem [shape: bf16[512,128], index: 3, kind: input, shape index: {}]   ;;  %s4957_s4 = inlined_call_operand.vmem [shape: f32[512,1], index: 4, kind: input, shape index: {}]   ;;  %s4958_s5 = inlined_call_operand.vmem [shape: bf16[256,512], index: 5, kind: input, shape index: {}]   ;;  %s4959_s6 = inlined_call_operand.vmem [shape: f32[256,1], index: 6, kind: input, shape index: {}]   ;;  %s4960_s7 = inlined_call_operand.vmem [shape: bf16[64,256], index: 7, kind: input, shape index: {}]   ;;  %s4961_s8 = inlined_call_operand.vmem [shape: f32[64,1], index: 8, kind: input, shape index: {}]   ;;  %s4962_s9 = inlined_call_operand.vmem [shape: f32[64,1], index: 9, kind: input, shape index: {}]   ;;  %s4963_s10 = inlined_call_operand.<no memory space> [shape: f32[1,1], index: 10, kind: input, shape index: {}]   ;;  %s4964_s11 = inlined_call_operand.hbm [shape: f32[1,512], index: 11, kind: output, shape index: {}]  }
   0x1   :  { %v16_v0 = vstv %s4963_s10 }
   0x2   :  { %17 = vst [vmem:[#allocation2] sm:$0x1] %v16_v0 }
   0x3   :  { %18 = vsyncpa [#allocation4], 0 }
   0x4   :  { %20 = vsyncpa [#allocation4 + $0x1], 0  ;;  %s3960_s19 = smov 0   ;;  %s3962_s20 = smov 0  }
   0x5   :  { %s3964_s21 = smov 0   ;;  %s3966_s22 = smov 0  }
   0x6 LB: > { %s3981_s10 = sadd.s32 4294967295, %s3891_s22   ;;  %s3372_s23 = sadd.s32 4294967294, %s3891_s22   ;;  %s3891_s22 = sphi %s3966_s22, %s4970_s22   ;;  %s3887_s21 = sphi %s3964_s21, %s4969_s21   ;;  %s3883_s20 = sphi %s3962_s20, %s4968_s20   ;;  %s3879_s19 = sphi %s3960_s19, %s4967_s19  }
   0x7   : > { %s3985_s24 = sadd.s32 1, %s3891_s22   ;;  %s269_s25 = sadd.s32 1, %s3887_s21 }
   0x8   : > { %s266_s26 = ssub.s32 %s3891_s22, %s3985_s24  ;;  %p279_p0 = scmp.ne.s32.totalorder %s3887_s21, %s3883_s20 }
   0x9   : > { %p267_p1 = scmp.eq.s32.totalorder %s266_s26, 0  ;;  %p280_p2 = scmp.eq.s32.totalorder %s3981_s10, 1 }
   0xa   : > { %p285_p3 = scmp.ne.s32.totalorder %s3883_s20, %s3879_s19  ;;  %p286_p4 = scmp.eq.s32.totalorder %s3372_s23, 1 }
   0xb   : > { %s3996_s27 = scalar_select %p267_p1, %s3887_s21, %s269_s25  }
   0xc   : > { %p3998_p5 = por %p280_p2, %p279_p0  ;;  %p4002_p6 = por %p286_p4, %p285_p3 }
   0xd   : > { %p3375_p7 = scmp.ge.s32.totalorder %s3891_s22, 1  ;;  %p343_p8 = scmp.lt.s32.totalorder %s3891_s22, 3 }
   0xf   : > { %p344_p9 = pnand %p3375_p7, %p343_p8 }
  0x10   : > { %v410_v1 = vld [vmem:[%s4955_s2 + $0x10] sm:$0xff] (!%p344_p9)  ;;  %v408_v2 = vld [vmem:[%s4955_s2] sm:$0xff] (!%p344_p9)  ;;  %s3377_s15 = sshll.u32 (!%p344_p9), %s3981_s10, 1  ;;  %v3893_v3 = vmov (!%p344_p9), 0   ;;  %vm574_vm0 = vcmask (!%p344_p9), 1041408   ;;  %v411_v4 = vld [vmem:[%s4955_s2 + $0x18] sm:$0xff] (!%p344_p9) }
  0x11   : > { %347 = sbr.rel (%p344_p9) target bundleno = 1416 (0x588), region = 64  ;;  %3678 = vset.pattern.permute.xlu1 (!%p344_p9), %v3893_v3  ;;  %3677 = vset.pattern.permute.xlu0 (!%p344_p9), %v3893_v3  ;;  %p384_p10 = scmp.lt.s32.totalorder (!%p344_p9), %s3377_s15, 3  ;;  %v409_v5 = vld [vmem:[%s4955_s2 + $0x8] sm:$0xff] (!%p344_p9)  ;;  %vm575_vm1 = vcmask (!%p344_p9), 1042432   ;;  %v3894_v6 = vmov (!%p344_p9), 65535   ;;  %v412_v9 = vld [vmem:[%s4955_s2 + $0x20] sm:$0xff] (!%p344_p9) }
  0x12   : > { %436 = vperm.xlu1 (!%p344_p9), %3678, %v410_v1   ;;  %426 = vperm.xlu0 (!%p344_p9), %3677, %v408_v2   ;;  %v576_v7 = vsel (!%p344_p9), %vm574_vm0, 4294967295, %v3894_v6  ;;  %v413_v8 = vld [vmem:[%s4955_s2 + $0x28] sm:$0xff] (!%p344_p9)  ;;  %v415_v16 = vld [vmem:[%s4955_s2 + $0x38] sm:$0xff] (!%p344_p9)  ;;  %v414_v17 = vld [vmem:[%s4955_s2 + $0x30] sm:$0xff] (!%p344_p9)  ;;  %vm549_vm2 = vcmask (!%p344_p9), 39936   ;;  %s380_s12 = sand.u32 (!%p344_p9), 1, %s3883_s20  }
  0x13   : > { %616 = vmatprep.mubr.bf16.mxu0 (!%p344_p9), %v3893_v3  ;;  %1417 = vmatprep.mubr.bf16.mxu1 (!%p344_p9), %v3893_v3  ;;  %v577_v11 = vsel (!%p344_p9), %vm575_vm1, %v576_v7, 0  ;;  %v3681_v18 = vld [vmem:[%s4954_s1] sm:$0xff] (!%p344_p9)   ;;  %v417_v19 = vld [vmem:[%s4955_s2 + $0x48] sm:$0xff] (!%p344_p9)  ;;  %v419_v21 = vld [vmem:[%s4955_s2 + $0x58] sm:$0xff] (!%p344_p9)  ;;  %s3376_s13 = sshll.u32 (!%p344_p9), %s380_s12, 1  ;;  %s3299_s26 = scalar_lea.sflag (!%p344_p9), [#allocation4], %s380_s12 }
  0x14   : > { %v416_v20 = vld [vmem:[%s4955_s2 + $0x40] sm:$0xff] (!%p344_p9)  ;;  %v418_v22 = vld [vmem:[%s4955_s2 + $0x50] sm:$0xff] (!%p344_p9)  ;;  %v3682_v23 = vld [vmem:[%s4954_s1 + $0x8] sm:$0xff] (!%p344_p9)   ;;  %s382_s16 = scalar_lea.vmem (!%p344_p9), [#allocation3], %s3376_s13 }
  0x15   : > { %v421_v24 = vld [vmem:[%s4955_s2 + $0x68] sm:$0xff] (!%p344_p9)  ;;  %v420_v25 = vld [vmem:[%s4955_s2 + $0x60] sm:$0xff] (!%p344_p9)  ;;  %v423_v26 = vld [vmem:[%s4955_s2 + $0x78] sm:$0xff] (!%p344_p9)  ;;  %s3313_s17 = sshll.u32 (!%p344_p9), %s382_s16, 4  ;;  %s4913_s17 = int_to_ptr.vmem [resolvable:$true] %s3313_s17 }
  0x16   : > { %441 = vperm.xlu1 (!%p344_p9), %3678, %v411_v4   ;;  %431 = vperm.xlu0 (!%p344_p9), %3677, %v409_v5   ;;  %v422_v27 = vld [vmem:[%s4955_s2 + $0x70] sm:$0xff] (!%p344_p9)  ;;  %v810_v29 = vld [vmem:[%s4957_s4 + $0x8] sm:$0xff] (!%p344_p9)  ;;  %v809_v30 = vld [vmem:[%s4957_s4] sm:$0xff] (!%p344_p9) }
  0x17   : > { %v3683_v28 = vld [vmem:[%s4954_s1 + $0x10] sm:$0xff] (!%p344_p9)   ;;  %v812_v31 = vld [vmem:[%s4957_s4 + $0x18] sm:$0xff] (!%p344_p9)  ;;  %v814_v34 = vld [vmem:[%s4957_s4 + $0x28] sm:$0xff] (!%p344_p9) }
  0x18   : > { %s4972_s15 = smov (!%p384_p10, %s3377_s15), 3  ;;  %v811_v32 = vld [vmem:[%s4957_s4 + $0x10] sm:$0xff]  ;;  %v3684_v33 = vld [vmem:[%s4954_s1 + $0x18] sm:$0xff]   ;;  %v813_v35 = vld [vmem:[%s4957_s4 + $0x20] sm:$0xff] }
  0x19   : > { %s3378_s25 = sshll.u32 %s4972_s15, 2  ;;  %v816_v36 = vld [vmem:[%s4957_s4 + $0x38] sm:$0xff]  ;;  %v815_v37 = vld [vmem:[%s4957_s4 + $0x30] sm:$0xff]  ;;  %v3685_v38 = vld [vmem:[%s4954_s1 + $0x20] sm:$0xff]  }
  0x1a   : > { %s387_s14 = scalar_lea.vmem %s4953_s0, %s3378_s25  ;;  %451 = vperm.xlu1 %3678, %v413_v8   ;;  %446 = vperm.xlu0 %3677, %v412_v9   ;;  %v818_v39 = vld [vmem:[%s4957_s4 + $0x48] sm:$0xff]  ;;  %v817_v40 = vld [vmem:[%s4957_s4 + $0x40] sm:$0xff]  ;;  %v820_v41 = vld [vmem:[%s4957_s4 + $0x58] sm:$0xff]  ;;  %s3829_s25 = scalar_lea.vmem %s4913_s17, 32 }
  0x1b   : > { %v391_v10 = vld [vmem:[%s387_s14] sm:$0x77]  ;;  %v819_v42 = vld [vmem:[%s4957_s4 + $0x50] sm:$0xff]  ;;  %v3686_v43 = vld [vmem:[%s4954_s1 + $0x28] sm:$0xff]   ;;  %s3506_s14 = sshll.u32 %s3981_s10, 5  ;;  %p3830_p11 = scmp.ne.s32.totalorder %s4913_s17, %s3829_s25 }
  0x1c   : > { %v3388_v12 = vcombine.high %v391_v10, %v391_v10  ;;  %v3387_v13 = vcombine.low %v391_v10, %v391_v10  ;;  %v822_v44 = vld [vmem:[%s4957_s4 + $0x68] sm:$0xff]  ;;  %v821_v45 = vld [vmem:[%s4957_s4 + $0x60] sm:$0xff]  ;;  %v824_v46 = vld [vmem:[%s4957_s4 + $0x78] sm:$0xff]  ;;  %s4911_s23 = scalar_lea.hbm %s4964_s11, %s3506_s14  ;;  %s3896_s10 = smov [#allocation3]  }
  0x1d   : > { %v823_v47 = vld [vmem:[%s4957_s4 + $0x70] sm:$0xff]  ;;  %v826_v49 = vld [vmem:[%s4957_s4 + $0x88] sm:$0xff]  ;;  %v825_v50 = vld [vmem:[%s4957_s4 + $0x80] sm:$0xff]  ;;  %p3831_p12 = pnand %p3830_p11, %p3998_p5  ;;  %s3833_s30 = sshll.u32 %s3896_s10, 4  ;;  %s3834_s30 = int_to_ptr.vmem [resolvable:$false] %s3833_s30 }
  0x1e   : > { %v582_v14 = vand.u32 %v3388_v12, %v577_v11  ;;  %v579_v15 = vand.u32 %v3387_v13, %v577_v11  ;;  %461 = vperm.xlu1 %3678, %v415_v16   ;;  %456 = vperm.xlu0 %3677, %v414_v17   ;;  %v3687_v48 = vld [vmem:[%s4954_s1 + $0x30] sm:$0xff]   ;;  %v828_v51 = vld [vmem:[%s4957_s4 + $0x98] sm:$0xff]  ;;  %v830_v54 = vld [vmem:[%s4957_s4 + $0xa8] sm:$0xff]  ;;  %s3835_s13 = scalar_lea.vmem %s3834_s30, 64  ;;  %p3836_p0 = scmp.lt.s32.totalorder %s4913_s17, %s3834_s30 }
  0x1f   : > { %v827_v52 = vld [vmem:[%s4957_s4 + $0x90] sm:$0xff]  ;;  %v3688_v53 = vld [vmem:[%s4954_s1 + $0x38] sm:$0xff]   ;;  %v829_v55 = vld [vmem:[%s4957_s4 + $0xa0] sm:$0xff]  ;;  %p3832_p13 = pneg %p3831_p12  ;;  %p3837_p1 = scmp.lt.s32.totalorder %s3835_s13, %s3829_s25 }
  0x20   : > { %584 = vmatprep.subr.bf16.mxu0 %v582_v14  ;;  %v832_v56 = vld [vmem:[%s4957_s4 + $0xb8] sm:$0xff]  ;;  %v831_v57 = vld [vmem:[%s4957_s4 + $0xb0] sm:$0xff]  ;;  %v834_v58 = vld [vmem:[%s4957_s4 + $0xc8] sm:$0xff] }
  0x21   : > { %585 = vmatpush1.bf16.msra.mxu0 %v579_v15  ;;  %v833_v59 = vld [vmem:[%s4957_s4 + $0xc0] sm:$0xff]  ;;  %v836_v60 = vld [vmem:[%s4957_s4 + $0xd8] sm:$0xff]  ;;  %v835_v61 = vld [vmem:[%s4957_s4 + $0xd0] sm:$0xff]  ;;  %p3838_p2 = por %p3837_p1, %p3836_p0 }
  0x22   : > { %471 = vperm.xlu1 %3678, %v417_v19   ;;  %466 = vperm.xlu0 %3677, %v416_v20   ;;  %v838_v62 = vld [vmem:[%s4957_s4 + $0xe8] sm:$0xff]  ;;  %v837_v63 = vld [vmem:[%s4957_s4 + $0xe0] sm:$0xff]  ;;  %v840_v0 = vld [vmem:[%s4957_s4 + $0xf8] sm:$0xff] }
  0x23   : > { %v839_v1 = vld [vmem:[%s4957_s4 + $0xf0] sm:$0xff]  ;;  %v842_v2 = vld [vmem:[%s4957_s4 + $0x108] sm:$0xff]  ;;  %v841_v4 = vld [vmem:[%s4957_s4 + $0x100] sm:$0xff]  ;;  %p3839_p3 = pnand %p3838_p2, %p3832_p13 }
  0x24   : > { %3389 = vmatmul.mubr.msk.bf16.vlgmr.msra.gmra.mrb[0].mxu0 %vm549_vm2, %v3681_v18  ;;  %v844_v5 = vld [vmem:[%s4957_s4 + $0x118] sm:$0xff]  ;;  %v843_v6 = vld [vmem:[%s4957_s4 + $0x110] sm:$0xff]  ;;  %v846_v7 = vld [vmem:[%s4957_s4 + $0x128] sm:$0xff] }
  0x25   : > { %626 = vmatprep.mubr.bf16.mxu0 %v3893_v3  ;;  %v845_v8 = vld [vmem:[%s4957_s4 + $0x120] sm:$0xff]  ;;  %v848_v9 = vld [vmem:[%s4957_s4 + $0x138] sm:$0xff]  ;;  %v847_v10 = vld [vmem:[%s4957_s4 + $0x130] sm:$0xff] }
  0x26   : > { %481 = vperm.xlu1 %3678, %v419_v21   ;;  %476 = vperm.xlu0 %3677, %v418_v22   ;;  %v850_v11 = vld [vmem:[%s4957_s4 + $0x148] sm:$0xff]  ;;  %v849_v12 = vld [vmem:[%s4957_s4 + $0x140] sm:$0xff]  ;;  %v852_v13 = vld [vmem:[%s4957_s4 + $0x158] sm:$0xff] }
  0x27   : > { %v851_v14 = vld [vmem:[%s4957_s4 + $0x150] sm:$0xff]  ;;  %v854_v15 = vld [vmem:[%s4957_s4 + $0x168] sm:$0xff]  ;;  %v853_v16 = vld [vmem:[%s4957_s4 + $0x160] sm:$0xff] }
  0x28   : > { %v856_v17 = vld [vmem:[%s4957_s4 + $0x178] sm:$0xff]  ;;  %v855_v18 = vld [vmem:[%s4957_s4 + $0x170] sm:$0xff]  ;;  %v858_v19 = vld [vmem:[%s4957_s4 + $0x188] sm:$0xff] }
  0x29   : > { %v857_v20 = vld [vmem:[%s4957_s4 + $0x180] sm:$0xff]  ;;  %v860_v21 = vld [vmem:[%s4957_s4 + $0x198] sm:$0xff]  ;;  %v859_v22 = vld [vmem:[%s4957_s4 + $0x190] sm:$0xff] }
  0x2a   : > { %491 = vperm.xlu1 %3678, %v421_v24   ;;  %486 = vperm.xlu0 %3677, %v420_v25   ;;  %v861_v24 = vld [vmem:[%s4957_s4 + $0x1a0] sm:$0xff]  ;;  %v864_v25 = vld [vmem:[%s4957_s4 + $0x1b8] sm:$0xff] }
  0x2c   : > { %3390 = vmatmul.mubr.msk.bf16.gmra.mrb[4].mxu0 %vm549_vm2, %v3682_v23  ;;  %v862_v23 = vld [vmem:[%s4957_s4 + $0x1a8] sm:$0xff] }
  0x2d   : > { %636 = vmatprep.mubr.bf16.mxu0 %v3893_v3 }
  0x2e   : > { %501 = vperm.xlu1 %3678, %v423_v26   ;;  %496 = vperm.xlu0 %3677, %v422_v27   ;;  %v863_v26 = vld [vmem:[%s4957_s4 + $0x1b0] sm:$0xff]  ;;  %v866_v27 = vld [vmem:[%s4957_s4 + $0x1c8] sm:$0xff] }
  0x32   : > { %880 = vperm.xlu1 %3678, %v810_v29   ;;  %875 = vperm.xlu0 %3677, %v809_v30   ;;  %v868_v29 = vld [vmem:[%s4957_s4 + $0x1d8] sm:$0xff]  ;;  %v867_v30 = vld [vmem:[%s4957_s4 + $0x1d0] sm:$0xff] }
  0x34   : > { %3391 = vmatmul.mubr.msk.bf16.gmra.mrb[8].mxu0 %vm549_vm2, %v3683_v28  ;;  %v865_v28 = vld [vmem:[%s4957_s4 + $0x1c0] sm:$0xff] }
  0x35   : > { %646 = vmatprep.mubr.bf16.mxu0 %v3893_v3 }
  0x36   : > { %890 = vperm.xlu1 %3678, %v812_v31   ;;  %885 = vperm.xlu0 %3677, %v811_v32   ;;  %v870_v31 = vld [vmem:[%s4957_s4 + $0x1e8] sm:$0xff]  ;;  %v869_v32 = vld [vmem:[%s4957_s4 + $0x1e0] sm:$0xff] }
  0x3a   : > { %900 = vperm.xlu1 %3678, %v814_v34   ;;  %895 = vperm.xlu0 %3677, %v813_v35   ;;  %v871_v34 = vld [vmem:[%s4957_s4 + $0x1f0] sm:$0xff]  ;;  %v1995_v35 = vld [vmem:[%s4959_s6 + $0x8] sm:$0xff] }
  0x3c   : > { %3392 = vmatmul.mubr.msk.bf16.gmra.mrb[12].mxu0 %vm549_vm2, %v3684_v33  ;;  %v872_v33 = vld [vmem:[%s4957_s4 + $0x1f8] sm:$0xff] }
  0x3d   : > { %656 = vmatprep.mubr.bf16.mxu0 %v3893_v3 }
  0x3e   : > { %910 = vperm.xlu1 %3678, %v816_v36   ;;  %905 = vperm.xlu0 %3677, %v815_v37   ;;  %v1994_v36 = vld [vmem:[%s4959_s6] sm:$0xff]  ;;  %v1997_v37 = vld [vmem:[%s4959_s6 + $0x18] sm:$0xff] }
  0x42   : > { %920 = vperm.xlu1 %3678, %v818_v39   ;;  %915 = vperm.xlu0 %3677, %v817_v40   ;;  %v1999_v39 = vld [vmem:[%s4959_s6 + $0x28] sm:$0xff]  ;;  %v1998_v40 = vld [vmem:[%s4959_s6 + $0x20] sm:$0xff] }
  0x44   : > { %3393 = vmatmul.mubr.msk.bf16.gmra.mrb[16].mxu0 %vm549_vm2, %v3685_v38  ;;  %v1996_v38 = vld [vmem:[%s4959_s6 + $0x10] sm:$0xff] }
  0x45   : > { %666 = vmatprep.mubr.bf16.mxu0 %v3893_v3 }
  0x46   : > { %930 = vperm.xlu1 %3678, %v820_v41   ;;  %925 = vperm.xlu0 %3677, %v819_v42  }
  0x4a   : > { %940 = vperm.xlu1 %3678, %v822_v44   ;;  %935 = vperm.xlu0 %3677, %v821_v45   ;;  %v2000_v44 = vld [vmem:[%s4959_s6 + $0x30] sm:$0xff] }
  0x4c   : > { %3394 = vmatmul.mubr.msk.bf16.gmra.mrb[20].mxu0 %vm549_vm2, %v3686_v43  ;;  %v2001_v43 = vld [vmem:[%s4959_s6 + $0x38] sm:$0xff] }
  0x4d   : > { %676 = vmatprep.mubr.bf16.mxu0 %v3893_v3 }
  0x4e   : > { %950 = vperm.xlu1 %3678, %v824_v46   ;;  %945 = vperm.xlu0 %3677, %v823_v47   ;;  %v2003_v46 = vld [vmem:[%s4959_s6 + $0x48] sm:$0xff]  ;;  %v2002_v47 = vld [vmem:[%s4959_s6 + $0x40] sm:$0xff] }
  0x52   : > { %960 = vperm.xlu1 %3678, %v826_v49   ;;  %955 = vperm.xlu0 %3677, %v825_v50   ;;  %v2005_v49 = vld [vmem:[%s4959_s6 + $0x58] sm:$0xff]  ;;  %v2004_v50 = vld [vmem:[%s4959_s6 + $0x50] sm:$0xff] }
  0x54   : > { %3395 = vmatmul.mubr.msk.bf16.gmra.mrb[24].mxu0 %vm549_vm2, %v3687_v48 }
  0x55   : > { %686 = vmatprep.mubr.bf16.mxu0 %v3893_v3 }
  0x56   : > { %970 = vperm.xlu1 %3678, %v828_v51   ;;  %965 = vperm.xlu0 %3677, %v827_v52  }
  0x5a   : > { %980 = vperm.xlu1 %3678, %v830_v54   ;;  %975 = vperm.xlu0 %3677, %v829_v55   ;;  %v2006_v54 = vld [vmem:[%s4959_s6 + $0x60] sm:$0xff] }
  0x5c   : > { %3396 = vmatmul.mubr.msk.bf16.gmra.mrb[28].mxu0 %vm549_vm2, %v3688_v53  ;;  %v2007_v53 = vld [vmem:[%s4959_s6 + $0x68] sm:$0xff] }
  0x5e   : > { %990 = vperm.xlu1 %3678, %v832_v56   ;;  %985 = vperm.xlu0 %3677, %v831_v57   ;;  %v2009_v56 = vld [vmem:[%s4959_s6 + $0x78] sm:$0xff]  ;;  %v2008_v57 = vld [vmem:[%s4959_s6 + $0x70] sm:$0xff] }
  0x62   : > { %1000 = vperm.xlu1 %3678, %v834_v58   ;;  %995 = vperm.xlu0 %3677, %v833_v59   ;;  %v2011_v59 = vld [vmem:[%s4959_s6 + $0x88] sm:$0xff] }
  0x66   : > { %1010 = vperm.xlu1 %3678, %v836_v60   ;;  %1005 = vperm.xlu0 %3677, %v835_v61   ;;  %v2010_v60 = vld [vmem:[%s4959_s6 + $0x80] sm:$0xff] }
  0x6a   : > { %1020 = vperm.xlu1 %3678, %v838_v62   ;;  %1015 = vperm.xlu0 %3677, %v837_v63   ;;  %v2013_v63 = vld [vmem:[%s4959_s6 + $0x98] sm:$0xff] }
  0x6e   : > { %1030 = vperm.xlu1 %3678, %v840_v0   ;;  %1025 = vperm.xlu0 %3677, %v839_v1   ;;  %v2012_v0 = vld [vmem:[%s4959_s6 + $0x90] sm:$0xff] }
  0x72   : > { %1040 = vperm.xlu1 %3678, %v842_v2   ;;  %1035 = vperm.xlu0 %3677, %v841_v4   ;;  %v2015_v2 = vld [vmem:[%s4959_s6 + $0xa8] sm:$0xff]  ;;  %v2014_v4 = vld [vmem:[%s4959_s6 + $0xa0] sm:$0xff] }
  0x76   : > { %1050 = vperm.xlu1 %3678, %v844_v5   ;;  %1045 = vperm.xlu0 %3677, %v843_v6   ;;  %v2017_v6 = vld [vmem:[%s4959_s6 + $0xb8] sm:$0xff] }
  0x7a   : > { %1060 = vperm.xlu1 %3678, %v846_v7   ;;  %1055 = vperm.xlu0 %3677, %v845_v8   ;;  %v2016_v7 = vld [vmem:[%s4959_s6 + $0xb0] sm:$0xff] }
  0x7e   : > { %1070 = vperm.xlu1 %3678, %v848_v9   ;;  %1065 = vperm.xlu0 %3677, %v847_v10   ;;  %v2019_v10 = vld [vmem:[%s4959_s6 + $0xc8] sm:$0xff] }
  0x82   : > { %1080 = vperm.xlu1 %3678, %v850_v11   ;;  %1075 = vperm.xlu0 %3677, %v849_v12   ;;  %v2018_v11 = vld [vmem:[%s4959_s6 + $0xc0] sm:$0xff] }
  0x86   : > { %1090 = vperm.xlu1 %3678, %v852_v13   ;;  %1085 = vperm.xlu0 %3677, %v851_v14   ;;  %v2021_v13 = vld [vmem:[%s4959_s6 + $0xd8] sm:$0xff]  ;;  %v2020_v14 = vld [vmem:[%s4959_s6 + $0xd0] sm:$0xff] }
  0x8a   : > { %1100 = vperm.xlu1 %3678, %v854_v15   ;;  %1095 = vperm.xlu0 %3677, %v853_v16   ;;  %v2023_v16 = vld [vmem:[%s4959_s6 + $0xe8] sm:$0xff] }
  0x8e   : > { %1110 = vperm.xlu1 %3678, %v856_v17   ;;  %1105 = vperm.xlu0 %3677, %v855_v18   ;;  %v2022_v17 = vld [vmem:[%s4959_s6 + $0xe0] sm:$0xff] }
  0x91   : > { %v4313_v41 = vpop.permute.xlu0 %426  ;;  %v4315_v42 = vpop.permute.xlu1 %436 }
  0x92   : > { %1120 = vperm.xlu1 %3678, %v858_v19   ;;  %1115 = vperm.xlu0 %3677, %v857_v20   ;;  %v2025_v20 = vld [vmem:[%s4959_s6 + $0xf8] sm:$0xff] }
  0x95   : > { %v4323_v45 = vpop.permute.xlu0 %431  ;;  %v4331_v48 = vpop.permute.xlu1 %441 }
  0x96   : > { %1130 = vperm.xlu1 %3678, %v860_v21   ;;  %1125 = vperm.xlu0 %3677, %v859_v22   ;;  %v2024_v21 = vld [vmem:[%s4959_s6 + $0xf0] sm:$0xff] }
  0x99   : > { %v4339_v51 = vpop.permute.xlu0 %446  ;;  %v4341_v52 = vpop.permute.xlu1 %451 }
  0x9a   : > { %1140 = vperm.xlu1 %3678, %v862_v23   ;;  %1135 = vperm.xlu0 %3677, %v861_v24   ;;  %v2997_v23 = vld [vmem:[%s4961_s8 + $0x8] sm:$0xff]  ;;  %v2996_v24 = vld [vmem:[%s4961_s8] sm:$0xff] }
  0x9d   : > { %v4349_v55 = vpop.permute.xlu0 %456  ;;  %v4357_v58 = vpop.permute.xlu1 %461 }
  0x9e   : > { %1150 = vperm.xlu1 %3678, %v864_v25   ;;  %1145 = vperm.xlu0 %3677, %v863_v26  }
  0xa1   : > { %v4365_v61 = vpop.permute.xlu0 %466  ;;  %v4367_v62 = vpop.permute.xlu1 %471 }
  0xa2   : > { %1160 = vperm.xlu1 %3678, %v866_v27   ;;  %1155 = vperm.xlu0 %3677, %v865_v28   ;;  %v2999_v27 = vld [vmem:[%s4961_s8 + $0x18] sm:$0xff]  ;;  %v2998_v28 = vld [vmem:[%s4961_s8 + $0x10] sm:$0xff] }
  0xa5   : > { %v4375_v1 = vpop.permute.xlu0 %476  ;;  %v4383_v5 = vpop.permute.xlu1 %481 }
  0xa6   : > { %1170 = vperm.xlu1 %3678, %v868_v29   ;;  %1165 = vperm.xlu0 %3677, %v867_v30  }
  0xa9   : > { %v4391_v8 = vpop.permute.xlu0 %486  ;;  %v4393_v9 = vpop.permute.xlu1 %491 }
  0xaa   : > { %1180 = vperm.xlu1 %3678, %v870_v31   ;;  %1175 = vperm.xlu0 %3677, %v869_v32  }
  0xad   : > { %v4401_v12 = vpop.permute.xlu0 %496  ;;  %v4409_v15 = vpop.permute.xlu1 %501 }
  0xae   : > { %1190 = vperm.xlu1 %3678, %v872_v33   ;;  %1185 = vperm.xlu0 %3677, %v871_v34  }
  0xb1   : > { %v4417_v18 = vpop.permute.xlu0 %875  ;;  %v4419_v19 = vpop.permute.xlu1 %880 }
  0xb2   : > { %2033 = vperm.xlu1 %3678, %v1995_v35   ;;  %2028 = vperm.xlu0 %3677, %v1994_v36  }
  0xb5   : > { %v4427_v22 = vpop.permute.xlu0 %885  ;;  %v4435_v25 = vpop.permute.xlu1 %890 }
  0xb6   : > { %2043 = vperm.xlu1 %3678, %v1997_v37   ;;  %2038 = vperm.xlu0 %3677, %v1996_v38   ;;  %v3174_v37 = vld [vmem:[%s4962_s9 + $0x8] sm:$0xff]  ;;  %v3173_v38 = vld [vmem:[%s4962_s9] sm:$0xff] }
  0xb9   : > { %v4443_v30 = vpop.permute.xlu0 %895  ;;  %v4446_v32 = vpop.permute.xlu1 %900 }
  0xba   : > { %2053 = vperm.xlu1 %3678, %v1999_v39   ;;  %2048 = vperm.xlu0 %3677, %v1998_v40  }
  0xbe   : > { %2063 = vperm.xlu1 %3678, %v2001_v43   ;;  %2058 = vperm.xlu0 %3677, %v2000_v44  }
  0xc2   : > { %2073 = vperm.xlu1 %3678, %v2003_v46   ;;  %2068 = vperm.xlu0 %3677, %v2002_v47   ;;  %v4457_v46 = vpop.permute.xlu0 %905 }
  0xc6   : > { %2083 = vperm.xlu1 %3678, %v2005_v49   ;;  %2078 = vperm.xlu0 %3677, %v2004_v50   ;;  %v3175_v49 = vld [vmem:[%s4962_s9 + $0x10] sm:$0xff] }
  0xca   : > { %2093 = vperm.xlu1 %3678, %v2007_v53   ;;  %2088 = vperm.xlu0 %3677, %v2006_v54   ;;  %v4462_v53 = vpop.permute.xlu1 %910 }
  0xce   : > { %2103 = vperm.xlu1 %3678, %v2009_v56   ;;  %2098 = vperm.xlu0 %3677, %v2008_v57  }
  0xd2   : > { %2113 = vperm.xlu1 %3678, %v2011_v59   ;;  %2108 = vperm.xlu0 %3677, %v2010_v60  }
  0xd6   : > { %2123 = vperm.xlu1 %3678, %v2013_v63   ;;  %2118 = vperm.xlu0 %3677, %v2012_v0  }
  0xda   : > { %2133 = vperm.xlu1 %3678, %v2015_v2   ;;  %2128 = vperm.xlu0 %3677, %v2014_v4   ;;  %v3176_v2 = vld [vmem:[%s4962_s9 + $0x18] sm:$0xff] }
  0xde   : > { %2143 = vperm.xlu1 %3678, %v2017_v6   ;;  %2138 = vperm.xlu0 %3677, %v2016_v7   ;;  %v3001_v6 = vld [vmem:[%s4961_s8 + $0x28] sm:$0xff]  ;;  %v4477_v7 = vpop.permute.xlu0 %915 }
  0xe2   : > { %2153 = vperm.xlu1 %3678, %v2019_v10   ;;  %2148 = vperm.xlu0 %3677, %v2018_v11   ;;  %v4479_v11 = vpop.permute.xlu1 %920 }
  0xe6   : > { %2163 = vperm.xlu1 %3678, %v2021_v13   ;;  %2158 = vperm.xlu0 %3677, %v2020_v14  }
  0xea   : > { %2173 = vperm.xlu1 %3678, %v2023_v16   ;;  %2168 = vperm.xlu0 %3677, %v2022_v17  }
  0xee   : > { %2183 = vperm.xlu1 %3678, %v2025_v20   ;;  %2178 = vperm.xlu0 %3677, %v2024_v21  }
  0xf2   : > { %3011 = vperm.xlu1 %3678, %v2997_v23   ;;  %3006 = vperm.xlu0 %3677, %v2996_v24   ;;  %v3002_v23 = vld [vmem:[%s4961_s8 + $0x30] sm:$0xff] }
  0xf6   : > { %3021 = vperm.xlu1 %3678, %v2999_v27   ;;  %3016 = vperm.xlu0 %3677, %v2998_v28   ;;  %v4489_v28 = vpop.permute.xlu0 %925 }
  0xf7   : > { %v618_v26 = vpop.f32.mrb[0].mxu0 }
  0xf8   : > { %v620_v29 = vpop.f32.mrb[1].mxu0  ;;  %v619_v31 = vadd.f32 %v618_v26, %v4313_v41 }
  0xf9   : > { %v621_v33 = vadd.f32 %v620_v29, %v4313_v41  ;;  %v622_v34 = vpop.f32.mrb[2].mxu0 }
  0xfa   : > { %v623_v35 = vadd.f32 %v622_v34, %v4323_v45  ;;  %v624_v36 = vpop.f32.mrb[3].mxu0  ;;  %v697_v40 = vmax.f32 %v619_v31, 0.0  ;;  %3188 = vperm.xlu1 %3678, %v3174_v37   ;;  %3183 = vperm.xlu0 %3677, %v3173_v38   ;;  %v4495_v34 = vpop.permute.xlu1 %930 }
  0xfb   : > { %v625_v39 = vadd.f32 %v624_v36, %v4323_v45  ;;  %v698_v44 = vmax.f32 %v621_v33, 0.0  ;;  %v3000_v45 = vld [vmem:[%s4961_s8 + $0x20] sm:$0xff]  ;;  %v3178_v33 = vld [vmem:[%s4962_s9 + $0x28] sm:$0xff] }
  0xfc   : > { %v699_v43 = vmax.f32 %v623_v35, 0.0 }
  0xfd   : > { %v700_v41 = vmax.f32 %v625_v39, 0.0 }
  0xfe   : > { %v793_v50 = vpack.c.bf16 %v699_v43, %v697_v40  ;;  %3193 = vperm.xlu1 %3678, %v3175_v49   ;;  %3026 = vperm.xlu0 %3677, %v3000_v45   ;;  %v4507_v49 = vpop.permute.xlu0 %935 }
  0xff   : > { %v628_v47 = vpop.f32.mrb[4].mxu0  ;;  %v794_v56 = vpack.c.bf16 %v700_v41, %v698_v44  ;;  %v3180_v44 = vld [vmem:[%s4962_s9 + $0x38] sm:$0xff] }
 0x100   : > { %v630_v54 = vpop.f32.mrb[5].mxu0  ;;  %v629_v57 = vadd.f32 %v628_v47, %v4315_v42 }
 0x101   : > { %v631_v59 = vadd.f32 %v630_v54, %v4315_v42  ;;  %v632_v60 = vpop.f32.mrb[6].mxu0  ;;  %1385 = vmatprep.subr.bf16.mxu1 %v794_v56  ;;  %v4510_v54 = vpop.permute.xlu1 %940 }
 0x102   : > { %v633_v63 = vadd.f32 %v632_v60, %v4331_v48  ;;  %v634_v0 = vpop.f32.mrb[7].mxu0  ;;  %1386 = vmatpush1.bf16.msra.mxu1 %v793_v50  ;;  %v701_v42 = vmax.f32 %v629_v57, 0.0  ;;  %3198 = vperm.xlu1 %3678, %v3176_v2  }
 0x103   : > { %v635_v4 = vadd.f32 %v634_v0, %v4331_v48  ;;  %v702_v13 = vmax.f32 %v631_v59, 0.0  ;;  %3031 = vperm.xlu0 %3677, %v3001_v6   ;;  %v3177_v48 = vld [vmem:[%s4962_s9 + $0x20] sm:$0xff] }
 0x104   : > { %v703_v10 = vmax.f32 %v633_v63, 0.0  ;;  %v3263_v63 = vld [vmem:[#allocation2] sm:$0x1] }
 0x105   : > { %v704_v14 = vmax.f32 %v635_v4, 0.0 }
 0x106   : > { %v795_v16 = vpack.c.bf16 %v703_v10, %v701_v42  ;;  %3203 = vperm.xlu1 %3678, %v3177_v48   ;;  %v4515_v42 = vpop.permute.xlu0 %945 }
 0x107   : > { %v638_v17 = vpop.f32.mrb[8].mxu0  ;;  %v796_v20 = vpack.c.bf16 %v704_v14, %v702_v13  ;;  %3036 = vperm.xlu0 %3677, %v3002_v23  }
 0x108   : > { %v640_v21 = vpop.f32.mrb[9].mxu0  ;;  %v639_v24 = vadd.f32 %v638_v17, %v4339_v51 }
 0x109   : > { %v641_v26 = vadd.f32 %v640_v21, %v4339_v51  ;;  %v642_v27 = vpop.f32.mrb[10].mxu0  ;;  %1387 = vmatprep.subr.bf16.mxu1 %v796_v20  ;;  %v3003_v51 = vld [vmem:[%s4961_s8 + $0x38] sm:$0xff] }
 0x10a   : > { %v643_v29 = vadd.f32 %v642_v27, %v4341_v52  ;;  %v644_v31 = vpop.f32.mrb[11].mxu0  ;;  %1388 = vmatpush1.bf16.msra.mxu1 %v795_v16  ;;  %v705_v36 = vmax.f32 %v639_v24, 0.0  ;;  %3208 = vperm.xlu1 %3678, %v3178_v33  }
 0x10b   : > { %v645_v35 = vadd.f32 %v644_v31, %v4341_v52  ;;  %v706_v38 = vmax.f32 %v641_v26, 0.0  ;;  %3041 = vperm.xlu0 %3677, %v3003_v51   ;;  %v3179_v52 = vld [vmem:[%s4962_s9 + $0x30] sm:$0xff] }
 0x10c   : > { %v707_v37 = vmax.f32 %v643_v29, 0.0 }
 0x10d   : > { %v708_v39 = vmax.f32 %v645_v35, 0.0 }
 0x10e   : > { %v797_v40 = vpack.c.bf16 %v707_v37, %v705_v36  ;;  %3218 = vperm.xlu1 %3678, %v3180_v44  }
 0x10f   : > { %v648_v43 = vpop.f32.mrb[12].mxu0  ;;  %v798_v41 = vpack.c.bf16 %v708_v39, %v706_v38  ;;  %3213 = vperm.xlu0 %3677, %v3179_v52  }
 0x110   : > { %v650_v47 = vpop.f32.mrb[13].mxu0  ;;  %v649_v50 = vadd.f32 %v648_v43, %v4349_v55 }
 0x111   : > { %v651_v56 = vadd.f32 %v650_v47, %v4349_v55  ;;  %v652_v45 = vpop.f32.mrb[14].mxu0  ;;  %1389 = vmatprep.subr.bf16.mxu1 %v798_v41 }
 0x112   : > { %v653_v57 = vadd.f32 %v652_v45, %v4357_v58  ;;  %v654_v59 = vpop.f32.mrb[15].mxu0  ;;  %1390 = vmatpush1.bf16.msra.mxu1 %v797_v40  ;;  %v709_v0 = vmax.f32 %v649_v50, 0.0 }
 0x113   : > { %v655_v60 = vadd.f32 %v654_v59, %v4357_v58  ;;  %v710_v4 = vmax.f32 %v651_v56, 0.0  ;;  %3266 = vperm.xlu0 %3677, %v3263_v63  }
 0x114   : > { %v711_v2 = vmax.f32 %v653_v57, 0.0 }
 0x115   : > { %v712_v6 = vmax.f32 %v655_v60, 0.0 }
 0x116   : > { %v799_v10 = vpack.c.bf16 %v711_v2, %v709_v0 }
 0x117   : > { %v658_v55 = vpop.f32.mrb[16].mxu0  ;;  %v800_v13 = vpack.c.bf16 %v712_v6, %v710_v4 }
 0x118   : > { %v660_v14 = vpop.f32.mrb[17].mxu0  ;;  %v659_v16 = vadd.f32 %v658_v55, %v4365_v61 }
 0x119   : > { %v661_v17 = vadd.f32 %v660_v14, %v4365_v61  ;;  %v662_v48 = vpop.f32.mrb[18].mxu0  ;;  %1391 = vmatprep.subr.bf16.mxu1 %v800_v13 }
 0x11a   : > { %v663_v58 = vadd.f32 %v662_v48, %v4367_v62  ;;  %v664_v20 = vpop.f32.mrb[19].mxu0  ;;  %1392 = vmatpush1.bf16.msra.mxu1 %v799_v10  ;;  %v713_v23 = vmax.f32 %v659_v16, 0.0 }
 0x11b   : > { %v665_v21 = vadd.f32 %v664_v20, %v4367_v62  ;;  %v714_v26 = vmax.f32 %v661_v17, 0.0 }
 0x11c   : > { %v715_v24 = vmax.f32 %v663_v58, 0.0 }
 0x11d   : > { %v716_v27 = vmax.f32 %v665_v21, 0.0 }
 0x11e   : > { %v801_v29 = vpack.c.bf16 %v715_v24, %v713_v23 }
 0x11f   : > { %v668_v31 = vpop.f32.mrb[20].mxu0  ;;  %v802_v33 = vpack.c.bf16 %v716_v27, %v714_v26  ;;  %v3689_v26 = vld [vmem:[%s4956_s3] sm:$0xff]   ;;  %v3692_v27 = vld [vmem:[%s4956_s3 + $0x18] sm:$0xff]  }
 0x120   : > { %v670_v35 = vpop.f32.mrb[21].mxu0  ;;  %v669_v51 = vadd.f32 %v668_v31, %v4375_v1  ;;  %v3694_v31 = vld [vmem:[%s4956_s3 + $0x28] sm:$0xff]  }
 0x121   : > { %v671_v61 = vadd.f32 %v670_v35, %v4375_v1  ;;  %v672_v36 = vpop.f32.mrb[22].mxu0  ;;  %1393 = vmatprep.subr.bf16.mxu1 %v802_v33  ;;  %v3695_v33 = vld [vmem:[%s4956_s3 + $0x30] sm:$0xff]   ;;  %v3696_v35 = vld [vmem:[%s4956_s3 + $0x38] sm:$0xff]  }
 0x122   : > { %v673_v37 = vadd.f32 %v672_v36, %v4383_v5  ;;  %v674_v38 = vpop.f32.mrb[23].mxu0  ;;  %1394 = vmatpush1.bf16.msra.mxu1 %v801_v29  ;;  %v717_v39 = vmax.f32 %v669_v51, 0.0  ;;  %v3693_v29 = vld [vmem:[%s4956_s3 + $0x20] sm:$0xff]   ;;  %v3699_v36 = vld [vmem:[%s4956_s3 + $0x50] sm:$0xff]  }
 0x123   : > { %v675_v62 = vadd.f32 %v674_v38, %v4383_v5  ;;  %v718_v43 = vmax.f32 %v671_v61, 0.0  ;;  %v3697_v51 = vld [vmem:[%s4956_s3 + $0x40] sm:$0xff]   ;;  %v3698_v61 = vld [vmem:[%s4956_s3 + $0x48] sm:$0xff]  }
 0x124   : > { %v719_v40 = vmax.f32 %v673_v37, 0.0  ;;  %v3700_v37 = vld [vmem:[%s4956_s3 + $0x58] sm:$0xff]   ;;  %v3701_v38 = vld [vmem:[%s4956_s3 + $0x60] sm:$0xff]  }
 0x125   : > { %v720_v44 = vmax.f32 %v675_v62, 0.0  ;;  %v3702_v62 = vld [vmem:[%s4956_s3 + $0x68] sm:$0xff]  }
 0x126   : > { %v803_v41 = vpack.c.bf16 %v719_v40, %v717_v39  ;;  %v3703_v39 = vld [vmem:[%s4956_s3 + $0x70] sm:$0xff]   ;;  %v3704_v40 = vld [vmem:[%s4956_s3 + $0x78] sm:$0xff]  }
 0x127   : > { %v678_v47 = vpop.f32.mrb[24].mxu0  ;;  %v804_v52 = vpack.c.bf16 %v720_v44, %v718_v43  ;;  %v3705_v43 = vld [vmem:[%s4956_s3 + $0x80] sm:$0xff]   ;;  %v3706_v44 = vld [vmem:[%s4956_s3 + $0x88] sm:$0xff]  }
 0x128   : > { %v680_v50 = vpop.f32.mrb[25].mxu0  ;;  %v679_v56 = vadd.f32 %v678_v47, %v4391_v8  ;;  %v3708_v47 = vld [vmem:[%s4956_s3 + $0x98] sm:$0xff]  }
 0x129   : > { %v681_v1 = vadd.f32 %v680_v50, %v4391_v8  ;;  %v682_v45 = vpop.f32.mrb[26].mxu0  ;;  %1395 = vmatprep.subr.bf16.mxu1 %v804_v52  ;;  %v3709_v52 = vld [vmem:[%s4956_s3 + $0xa0] sm:$0xff]   ;;  %v3710_v50 = vld [vmem:[%s4956_s3 + $0xa8] sm:$0xff]  }
 0x12a   : > { %v683_v57 = vadd.f32 %v682_v45, %v4393_v9  ;;  %v684_v59 = vpop.f32.mrb[27].mxu0  ;;  %1396 = vmatpush1.bf16.msra.mxu1 %v803_v41  ;;  %v721_v60 = vmax.f32 %v679_v56, 0.0  ;;  %v3707_v41 = vld [vmem:[%s4956_s3 + $0x90] sm:$0xff]   ;;  %v3713_v45 = vld [vmem:[%s4956_s3 + $0xc0] sm:$0xff]  }
 0x12b   : > { %v685_v5 = vadd.f32 %v684_v59, %v4393_v9  ;;  %v722_v0 = vmax.f32 %v681_v1, 0.0  ;;  %v3711_v56 = vld [vmem:[%s4956_s3 + $0xb0] sm:$0xff]   ;;  %v3712_v1 = vld [vmem:[%s4956_s3 + $0xb8] sm:$0xff]  }
 0x12c   : > { %v723_v63 = vmax.f32 %v683_v57, 0.0  ;;  %v3714_v57 = vld [vmem:[%s4956_s3 + $0xc8] sm:$0xff]   ;;  %v3715_v59 = vld [vmem:[%s4956_s3 + $0xd0] sm:$0xff]  }
 0x12d   : > { %v724_v2 = vmax.f32 %v685_v5, 0.0 }
 0x12e   : > { %v805_v4 = vpack.c.bf16 %v723_v63, %v721_v60 }
 0x12f   : > { %v688_v6 = vpop.f32.mrb[28].mxu0  ;;  %v806_v10 = vpack.c.bf16 %v724_v2, %v722_v0  ;;  %v3716_v0 = vld [vmem:[%s4956_s3 + $0xd8] sm:$0xff]  }
 0x130   : > { %v690_v55 = vpop.f32.mrb[29].mxu0  ;;  %v689_v13 = vadd.f32 %v688_v6, %v4401_v12 }
 0x131   : > { %v691_v8 = vadd.f32 %v690_v55, %v4401_v12  ;;  %v692_v14 = vpop.f32.mrb[30].mxu0  ;;  %1397 = vmatprep.subr.bf16.mxu1 %v806_v10  ;;  %v3690_v12 = vld [vmem:[%s4956_s3 + $0x8] sm:$0xff]   ;;  %v3723_v55 = vld [vmem:[%s4958_s5 + $0x4] ss:$16 sps:$4 sm:$0xff]  }
 0x132   : > { %v693_v16 = vadd.f32 %v692_v14, %v4409_v15  ;;  %v694_v17 = vpop.f32.mrb[31].mxu0  ;;  %1398 = vmatpush1.bf16.msra.mxu1 %v805_v4  ;;  %v725_v48 = vmax.f32 %v689_v13, 0.0  ;;  %2538 = vmatprep.mubr.bf16.mxu0 %v3723_v55 }
 0x133   : > { %v695_v9 = vadd.f32 %v694_v17, %v4409_v15  ;;  %v726_v20 = vmax.f32 %v691_v8, 0.0  ;;  %v3691_v15 = vld [vmem:[%s4956_s3 + $0x10] sm:$0xff]  }
 0x134   : > { %v727_v58 = vmax.f32 %v693_v16, 0.0 }
 0x135   : > { %v728_v21 = vmax.f32 %v695_v9, 0.0 }
 0x136   : > { %v807_v23 = vpack.c.bf16 %v727_v58, %v725_v48 }
 0x137   : > { %v808_v24 = vpack.c.bf16 %v728_v21, %v726_v20  ;;  %v3717_v21 = vld [vmem:[%s4956_s3 + $0xe0] sm:$0xff]  }
 0x139   : > { %1399 = vmatprep.subr.bf16.mxu1 %v808_v24 }
 0x13a   : > { %1400 = vmatpush1.bf16.msra.mxu1 %v807_v23 }
 0x13d   : > { %1418 = vmatmul.mubr.bf16.vlgmr.msra.gmra.mrb[0].mxu1 %v3689_v26 }
 0x13e   : > { %1427 = vmatprep.mubr.bf16.mxu1 %v3893_v3 }
 0x145   : > { %1428 = vmatmul.mubr.bf16.gmra.mrb[4].mxu1 %v3690_v12 }
 0x146   : > { %1437 = vmatprep.mubr.bf16.mxu1 %v3893_v3 }
 0x14d   : > { %1438 = vmatmul.mubr.bf16.gmra.mrb[8].mxu1 %v3691_v15 }
 0x14e   : > { %1447 = vmatprep.mubr.bf16.mxu1 %v3893_v3 }
 0x155   : > { %1448 = vmatmul.mubr.bf16.gmra.mrb[12].mxu1 %v3692_v27 }
 0x156   : > { %1457 = vmatprep.mubr.bf16.mxu1 %v3893_v3 }
 0x15d   : > { %1458 = vmatmul.mubr.bf16.gmra.mrb[16].mxu1 %v3693_v29 }
 0x15e   : > { %1467 = vmatprep.mubr.bf16.mxu1 %v3893_v3 }
 0x165   : > { %1468 = vmatmul.mubr.bf16.gmra.mrb[20].mxu1 %v3694_v31 }
 0x166   : > { %1477 = vmatprep.mubr.bf16.mxu1 %v3893_v3 }
 0x16d   : > { %1478 = vmatmul.mubr.bf16.gmra.mrb[24].mxu1 %v3695_v33 }
 0x16e   : > { %1487 = vmatprep.mubr.bf16.mxu1 %v3893_v3 }
 0x175   : > { %1488 = vmatmul.mubr.bf16.gmra.mrb[28].mxu1 %v3696_v35 }
 0x176   : > { %1497 = vmatprep.mubr.bf16.mxu1 %v3893_v3 }
 0x17d   : > { %1498 = vmatmul.mubr.bf16.gmra.mrb[32].mxu1 %v3697_v51 }
 0x17e   : > { %1507 = vmatprep.mubr.bf16.mxu1 %v3893_v3 }
 0x185   : > { %1508 = vmatmul.mubr.bf16.gmra.mrb[36].mxu1 %v3698_v61 }
 0x186   : > { %1517 = vmatprep.mubr.bf16.mxu1 %v3893_v3 }
 0x18d   : > { %1518 = vmatmul.mubr.bf16.gmra.mrb[40].mxu1 %v3699_v36  ;;  %v3718_v36 = vld [vmem:[%s4956_s3 + $0xe8] sm:$0xff]  }
 0x18e   : > { %1527 = vmatprep.mubr.bf16.mxu1 %v3893_v3 }
 0x195   : > { %1528 = vmatmul.mubr.bf16.gmra.mrb[44].mxu1 %v3700_v37 }
 0x196   : > { %1537 = vmatprep.mubr.bf16.mxu1 %v3893_v3 }
 0x19d   : > { %1538 = vmatmul.mubr.bf16.gmra.mrb[48].mxu1 %v3701_v38 }
 0x19e   : > { %1547 = vmatprep.mubr.bf16.mxu1 %v3893_v3 }
 0x1a5   : > { %1548 = vmatmul.mubr.bf16.gmra.mrb[52].mxu1 %v3702_v62 }
 0x1a6   : > { %1557 = vmatprep.mubr.bf16.mxu1 %v3893_v3 }
 0x1ad   : > { %1558 = vmatmul.mubr.bf16.gmra.mrb[56].mxu1 %v3703_v39 }
 0x1ae   : > { %1567 = vmatprep.mubr.bf16.mxu1 %v3893_v3 }
 0x1b5   : > { %1568 = vmatmul.mubr.bf16.gmra.mrb[60].mxu1 %v3704_v40 }
 0x1b6   : > { %1577 = vmatprep.mubr.bf16.mxu1 %v3893_v3 }
 0x1bd   : > { %1578 = vmatmul.mubr.bf16.gmra.mrb[64].mxu1 %v3705_v43 }
 0x1be   : > { %1587 = vmatprep.mubr.bf16.mxu1 %v3893_v3 }
 0x1c5   : > { %1588 = vmatmul.mubr.bf16.gmra.mrb[68].mxu1 %v3706_v44 }
 0x1c6   : > { %1597 = vmatprep.mubr.bf16.mxu1 %v3893_v3 }
 0x1cd   : > { %1598 = vmatmul.mubr.bf16.gmra.mrb[72].mxu1 %v3707_v41 }
 0x1ce   : > { %1607 = vmatprep.mubr.bf16.mxu1 %v3893_v3 }
 0x1d5   : > { %1608 = vmatmul.mubr.bf16.gmra.mrb[76].mxu1 %v3708_v47 }
 0x1d6   : > { %1617 = vmatprep.mubr.bf16.mxu1 %v3893_v3 }
 0x1dd   : > { %1618 = vmatmul.mubr.bf16.gmra.mrb[80].mxu1 %v3709_v52 }
 0x1de   : > { %1627 = vmatprep.mubr.bf16.mxu1 %v3893_v3 }
 0x1e5   : > { %1628 = vmatmul.mubr.bf16.gmra.mrb[84].mxu1 %v3710_v50 }
 0x1e6   : > { %1637 = vmatprep.mubr.bf16.mxu1 %v3893_v3 }
 0x1ed   : > { %1638 = vmatmul.mubr.bf16.gmra.mrb[88].mxu1 %v3711_v56 }
 0x1ee   : > { %1647 = vmatprep.mubr.bf16.mxu1 %v3893_v3 }
 0x1f5   : > { %1648 = vmatmul.mubr.bf16.gmra.mrb[92].mxu1 %v3712_v1  ;;  %v3719_v1 = vld [vmem:[%s4956_s3 + $0xf0] sm:$0xff]  }
 0x1f6   : > { %1657 = vmatprep.mubr.bf16.mxu1 %v3893_v3 }
 0x1fd   : > { %1658 = vmatmul.mubr.bf16.gmra.mrb[96].mxu1 %v3713_v45 }
 0x1fe   : > { %1667 = vmatprep.mubr.bf16.mxu1 %v3893_v3 }
 0x205   : > { %1668 = vmatmul.mubr.bf16.gmra.mrb[100].mxu1 %v3714_v57 }
 0x206   : > { %1677 = vmatprep.mubr.bf16.mxu1 %v3893_v3 }
 0x20d   : > { %1678 = vmatmul.mubr.bf16.gmra.mrb[104].mxu1 %v3715_v59 }
 0x20e   : > { %1687 = vmatprep.mubr.bf16.mxu1 %v3893_v3 }
 0x210   : > { %v1419_v5 = vpop.f32.mrb[0].mxu1 }
 0x211   : > { %v1420_v60 = vadd.f32 %v1419_v5, %v4417_v18  ;;  %v1421_v63 = vpop.f32.mrb[1].mxu1 }
 0x212   : > { %v1422_v2 = vadd.f32 %v1421_v63, %v4417_v18  ;;  %v1423_v4 = vpop.f32.mrb[2].mxu1 }
 0x213   : > { %v1424_v6 = vadd.f32 %v1423_v4, %v4419_v19  ;;  %v1425_v10 = vpop.f32.mrb[3].mxu1  ;;  %v1738_v8 = vmax.f32 %v1420_v60, 0.0 }
 0x214   : > { %v1426_v13 = vadd.f32 %v1425_v10, %v4419_v19  ;;  %v1739_v16 = vmax.f32 %v1422_v2, 0.0 }
 0x215   : > { %v1740_v14 = vmax.f32 %v1424_v6, 0.0  ;;  %1688 = vmatmul.mubr.bf16.gmra.mrb[108].mxu1 %v3716_v0 }
 0x216   : > { %v1741_v17 = vmax.f32 %v1426_v13, 0.0  ;;  %1697 = vmatprep.mubr.bf16.mxu1 %v3893_v3  ;;  %v3720_v13 = vld [vmem:[%s4956_s3 + $0xf8] sm:$0xff]  }
 0x217   : > { %v1930_v9 = vpack.c.bf16 %v1740_v14, %v1738_v8 }
 0x218   : > { %v1931_v18 = vpack.c.bf16 %v1741_v17, %v1739_v16  ;;  %v1429_v48 = vpop.f32.mrb[4].mxu1 }
 0x219   : > { %v1430_v58 = vadd.f32 %v1429_v48, %v4427_v22  ;;  %v1431_v20 = vpop.f32.mrb[5].mxu1 }
 0x21a   : > { %v1432_v19 = vadd.f32 %v1431_v20, %v4427_v22  ;;  %v1433_v23 = vpop.f32.mrb[6].mxu1  ;;  %2506 = vmatprep.subr.bf16.mxu0 %v1931_v18 }
 0x21b   : > { %v1434_v24 = vadd.f32 %v1433_v23, %v4435_v25  ;;  %v1435_v26 = vpop.f32.mrb[7].mxu1  ;;  %2507 = vmatpush1.bf16.msra.mxu0 %v1930_v9  ;;  %v1742_v15 = vmax.f32 %v1430_v58, 0.0 }
 0x21c   : > { %v1436_v12 = vadd.f32 %v1435_v26, %v4435_v25  ;;  %v1743_v29 = vmax.f32 %v1432_v19, 0.0 }
 0x21d   : > { %v1744_v27 = vmax.f32 %v1434_v24, 0.0  ;;  %1698 = vmatmul.mubr.bf16.gmra.mrb[112].mxu1 %v3717_v21 }
 0x21e   : > { %v1745_v31 = vmax.f32 %v1436_v12, 0.0  ;;  %1707 = vmatprep.mubr.bf16.mxu1 %v3893_v3 }
 0x21f   : > { %v1932_v33 = vpack.c.bf16 %v1744_v27, %v1742_v15 }
 0x220   : > { %v1933_v35 = vpack.c.bf16 %v1745_v31, %v1743_v29  ;;  %v1439_v51 = vpop.f32.mrb[8].mxu1 }
 0x221   : > { %v1440_v22 = vadd.f32 %v1439_v51, %v4443_v30  ;;  %v1441_v61 = vpop.f32.mrb[9].mxu1 }
 0x222   : > { %v1442_v37 = vadd.f32 %v1441_v61, %v4443_v30  ;;  %v1443_v25 = vpop.f32.mrb[10].mxu1  ;;  %2508 = vmatprep.subr.bf16.mxu0 %v1933_v35 }
 0x223   : > { %v1444_v38 = vadd.f32 %v1443_v25, %v4446_v32  ;;  %v1445_v62 = vpop.f32.mrb[11].mxu1  ;;  %2509 = vmatpush1.bf16.msra.mxu0 %v1932_v33  ;;  %v1746_v40 = vmax.f32 %v1440_v22, 0.0 }
 0x224   : > { %v1446_v39 = vadd.f32 %v1445_v62, %v4446_v32  ;;  %v1747_v44 = vmax.f32 %v1442_v37, 0.0 }
 0x225   : > { %v1748_v43 = vmax.f32 %v1444_v38, 0.0  ;;  %1708 = vmatmul.mubr.bf16.gmra.mrb[116].mxu1 %v3718_v36 }
 0x226   : > { %v1749_v41 = vmax.f32 %v1446_v39, 0.0  ;;  %1717 = vmatprep.mubr.bf16.mxu1 %v3893_v3 }
 0x227   : > { %v1934_v47 = vpack.c.bf16 %v1748_v43, %v1746_v40 }
 0x228   : > { %v1935_v52 = vpack.c.bf16 %v1749_v41, %v1747_v44  ;;  %v1449_v50 = vpop.f32.mrb[12].mxu1 }
 0x229   : > { %v1450_v30 = vadd.f32 %v1449_v50, %v4457_v46  ;;  %v1451_v56 = vpop.f32.mrb[13].mxu1  ;;  %v951_v50 = vpop.permute.xlu1 %950 }
 0x22a   : > { %v1452_v45 = vadd.f32 %v1451_v56, %v4457_v46  ;;  %v1453_v32 = vpop.f32.mrb[14].mxu1  ;;  %2510 = vmatprep.subr.bf16.mxu0 %v1935_v52 }
 0x22b   : > { %v1454_v57 = vadd.f32 %v1453_v32, %v4462_v53  ;;  %v1455_v59 = vpop.f32.mrb[15].mxu1  ;;  %2511 = vmatpush1.bf16.msra.mxu0 %v1934_v47  ;;  %v1750_v60 = vmax.f32 %v1450_v30, 0.0 }
 0x22c   : > { %v1456_v5 = vadd.f32 %v1455_v59, %v4462_v53  ;;  %v1751_v0 = vmax.f32 %v1452_v45, 0.0 }
 0x22d   : > { %v1752_v63 = vmax.f32 %v1454_v57, 0.0  ;;  %1718 = vmatmul.mubr.bf16.gmra.mrb[120].mxu1 %v3719_v1 }
 0x22e   : > { %v1753_v2 = vmax.f32 %v1456_v5, 0.0  ;;  %1727 = vmatprep.mubr.bf16.mxu1 %v3893_v3 }
 0x22f   : > { %v1936_v4 = vpack.c.bf16 %v1752_v63, %v1750_v60  ;;  %v956_v60 = vpop.permute.xlu0 %955 }
 0x230   : > { %v1937_v6 = vpack.c.bf16 %v1753_v2, %v1751_v0  ;;  %v1459_v10 = vpop.f32.mrb[16].mxu1 }
 0x231   : > { %v1460_v46 = vadd.f32 %v1459_v10, %v4477_v7  ;;  %v1461_v55 = vpop.f32.mrb[17].mxu1 }
 0x232   : > { %v1462_v8 = vadd.f32 %v1461_v55, %v4477_v7  ;;  %v1463_v53 = vpop.f32.mrb[18].mxu1  ;;  %2512 = vmatprep.subr.bf16.mxu0 %v1937_v6  ;;  %v961_v6 = vpop.permute.xlu1 %960 }
 0x233   : > { %v1464_v14 = vadd.f32 %v1463_v53, %v4479_v11  ;;  %v1465_v16 = vpop.f32.mrb[19].mxu1  ;;  %2513 = vmatpush1.bf16.msra.mxu0 %v1936_v4  ;;  %v1754_v17 = vmax.f32 %v1460_v46, 0.0 }
 0x234   : > { %v1466_v3 = vadd.f32 %v1465_v16, %v4479_v11  ;;  %v1755_v18 = vmax.f32 %v1462_v8, 0.0 }
 0x235   : > { %v1756_v9 = vmax.f32 %v1464_v14, 0.0  ;;  %1728 = vmatmul.mubr.bf16.gmra.mrb[124].mxu1 %v3720_v13 }
 0x236   : > { %v1757_v48 = vmax.f32 %v1466_v3, 0.0 }
 0x237   : > { %v1938_v58 = vpack.c.bf16 %v1756_v9, %v1754_v17  ;;  %v966_v17 = vpop.permute.xlu0 %965 }
 0x238   : > { %v1939_v20 = vpack.c.bf16 %v1757_v48, %v1755_v18  ;;  %v1469_v21 = vpop.f32.mrb[20].mxu1 }
 0x239   : > { %v1470_v19 = vadd.f32 %v1469_v21, %v4489_v28  ;;  %v1471_v23 = vpop.f32.mrb[21].mxu1 }
 0x23a   : > { %v1472_v7 = vadd.f32 %v1471_v23, %v4489_v28  ;;  %v1473_v24 = vpop.f32.mrb[22].mxu1  ;;  %2514 = vmatprep.subr.bf16.mxu0 %v1939_v20  ;;  %v971_v20 = vpop.permute.xlu1 %970 }
 0x23b   : > { %v1474_v26 = vadd.f32 %v1473_v24, %v4495_v34  ;;  %v1475_v12 = vpop.f32.mrb[23].mxu1  ;;  %2515 = vmatpush1.bf16.msra.mxu0 %v1938_v58  ;;  %v1758_v15 = vmax.f32 %v1470_v19, 0.0 }
 0x23c   : > { %v1476_v11 = vadd.f32 %v1475_v12, %v4495_v34  ;;  %v1759_v29 = vmax.f32 %v1472_v7, 0.0 }
 0x23d   : > { %v1760_v27 = vmax.f32 %v1474_v26, 0.0 }
 0x23e   : > { %v1761_v31 = vmax.f32 %v1476_v11, 0.0 }
 0x23f   : > { %v1940_v33 = vpack.c.bf16 %v1760_v27, %v1758_v15 }
 0x240   : > { %v1941_v35 = vpack.c.bf16 %v1761_v31, %v1759_v29  ;;  %v1479_v51 = vpop.f32.mrb[24].mxu1  ;;  %v976_v29 = vpop.permute.xlu0 %975 }
 0x241   : > { %v1480_v22 = vadd.f32 %v1479_v51, %v4507_v49  ;;  %v1481_v61 = vpop.f32.mrb[25].mxu1 }
 0x242   : > { %v1482_v28 = vadd.f32 %v1481_v61, %v4507_v49  ;;  %v1483_v36 = vpop.f32.mrb[26].mxu1  ;;  %2516 = vmatprep.subr.bf16.mxu0 %v1941_v35 }
 0x243   : > { %v1484_v37 = vadd.f32 %v1483_v36, %v4510_v54  ;;  %v1485_v25 = vpop.f32.mrb[27].mxu1  ;;  %2517 = vmatpush1.bf16.msra.mxu0 %v1940_v33  ;;  %v1762_v38 = vmax.f32 %v1480_v22, 0.0  ;;  %v981_v22 = vpop.permute.xlu1 %980 }
 0x244   : > { %v1486_v34 = vadd.f32 %v1485_v25, %v4510_v54  ;;  %v1763_v39 = vmax.f32 %v1482_v28, 0.0 }
 0x245   : > { %v1764_v62 = vmax.f32 %v1484_v37, 0.0 }
 0x246   : > { %v1765_v40 = vmax.f32 %v1486_v34, 0.0 }
 0x247   : > { %v1942_v43 = vpack.c.bf16 %v1764_v62, %v1762_v38 }
 0x248   : > { %v1943_v44 = vpack.c.bf16 %v1765_v40, %v1763_v39  ;;  %v1489_v41 = vpop.f32.mrb[28].mxu1 }
 0x249   : > { %v1490_v47 = vadd.f32 %v1489_v41, %v4515_v42  ;;  %v1491_v52 = vpop.f32.mrb[29].mxu1 }
 0x24a   : > { %v1492_v49 = vadd.f32 %v1491_v52, %v4515_v42  ;;  %v1493_v30 = vpop.f32.mrb[30].mxu1  ;;  %2518 = vmatprep.subr.bf16.mxu0 %v1943_v44 }
 0x24b   : > { %v1494_v56 = vadd.f32 %v1493_v30, %v951_v50  ;;  %v1495_v1 = vpop.f32.mrb[31].mxu1  ;;  %2519 = vmatpush1.bf16.msra.mxu0 %v1942_v43  ;;  %v1766_v54 = vmax.f32 %v1490_v47, 0.0  ;;  %v986_v43 = vpop.permute.xlu0 %985 }
 0x24c   : > { %v1496_v45 = vadd.f32 %v1495_v1, %v951_v50  ;;  %v1767_v57 = vmax.f32 %v1492_v49, 0.0  ;;  %v991_v50 = vpop.permute.xlu1 %990 }
 0x24d   : > { %v1768_v32 = vmax.f32 %v1494_v56, 0.0 }
 0x24e   : > { %v1769_v59 = vmax.f32 %v1496_v45, 0.0 }
 0x24f   : > { %v1944_v5 = vpack.c.bf16 %v1768_v32, %v1766_v54 }
 0x250   : > { %v1945_v63 = vpack.c.bf16 %v1769_v59, %v1767_v57  ;;  %v1499_v0 = vpop.f32.mrb[32].mxu1 }
 0x251   : > { %v1500_v2 = vadd.f32 %v1499_v0, %v956_v60  ;;  %v1501_v4 = vpop.f32.mrb[33].mxu1 }
 0x252   : > { %v1502_v10 = vadd.f32 %v1501_v4, %v956_v60  ;;  %v1503_v46 = vpop.f32.mrb[34].mxu1  ;;  %2520 = vmatprep.subr.bf16.mxu0 %v1945_v63  ;;  %v996_v60 = vpop.permute.xlu0 %995 }
 0x253   : > { %v1504_v42 = vadd.f32 %v1503_v46, %v961_v6  ;;  %v1505_v55 = vpop.f32.mrb[35].mxu1  ;;  %2521 = vmatpush1.bf16.msra.mxu0 %v1944_v5  ;;  %v1770_v8 = vmax.f32 %v1500_v2, 0.0 }
 0x254   : > { %v1506_v13 = vadd.f32 %v1505_v55, %v961_v6  ;;  %v1771_v14 = vmax.f32 %v1502_v10, 0.0  ;;  %v1001_v6 = vpop.permute.xlu1 %1000 }
 0x255   : > { %v1772_v53 = vmax.f32 %v1504_v42, 0.0 }
 0x256   : > { %v1773_v16 = vmax.f32 %v1506_v13, 0.0 }
 0x257   : > { %v1946_v3 = vpack.c.bf16 %v1772_v53, %v1770_v8 }
 0x258   : > { %v1947_v9 = vpack.c.bf16 %v1773_v16, %v1771_v14  ;;  %v1509_v18 = vpop.f32.mrb[36].mxu1 }
 0x259   : > { %v1510_v48 = vadd.f32 %v1509_v18, %v966_v17  ;;  %v1511_v58 = vpop.f32.mrb[37].mxu1 }
 0x25a   : > { %v1512_v21 = vadd.f32 %v1511_v58, %v966_v17  ;;  %v1513_v19 = vpop.f32.mrb[38].mxu1  ;;  %2522 = vmatprep.subr.bf16.mxu0 %v1947_v9  ;;  %v1006_v17 = vpop.permute.xlu0 %1005 }
 0x25b   : > { %v1514_v23 = vadd.f32 %v1513_v19, %v971_v20  ;;  %v1515_v7 = vpop.f32.mrb[39].mxu1  ;;  %2523 = vmatpush1.bf16.msra.mxu0 %v1946_v3  ;;  %v1774_v26 = vmax.f32 %v1510_v48, 0.0 }
 0x25c   : > { %v1516_v24 = vadd.f32 %v1515_v7, %v971_v20  ;;  %v1775_v11 = vmax.f32 %v1512_v21, 0.0  ;;  %v1011_v20 = vpop.permute.xlu1 %1010 }
 0x25d   : > { %v1776_v12 = vmax.f32 %v1514_v23, 0.0 }
 0x25e   : > { %v1777_v15 = vmax.f32 %v1516_v24, 0.0 }
 0x25f   : > { %v1948_v27 = vpack.c.bf16 %v1776_v12, %v1774_v26 }
 0x260   : > { %v1949_v31 = vpack.c.bf16 %v1777_v15, %v1775_v11  ;;  %v1519_v33 = vpop.f32.mrb[40].mxu1 }
 0x261   : > { %v1520_v35 = vadd.f32 %v1519_v33, %v976_v29  ;;  %v1521_v51 = vpop.f32.mrb[41].mxu1 }
 0x262   : > { %v1522_v61 = vadd.f32 %v1521_v51, %v976_v29  ;;  %v1523_v28 = vpop.f32.mrb[42].mxu1  ;;  %2524 = vmatprep.subr.bf16.mxu0 %v1949_v31  ;;  %v1016_v29 = vpop.permute.xlu0 %1015 }
 0x263   : > { %v1524_v36 = vadd.f32 %v1523_v28, %v981_v22  ;;  %v1525_v37 = vpop.f32.mrb[43].mxu1  ;;  %2525 = vmatpush1.bf16.msra.mxu0 %v1948_v27  ;;  %v1778_v34 = vmax.f32 %v1520_v35, 0.0 }
 0x264   : > { %v1526_v25 = vadd.f32 %v1525_v37, %v981_v22  ;;  %v1779_v62 = vmax.f32 %v1522_v61, 0.0  ;;  %v1021_v22 = vpop.permute.xlu1 %1020 }
 0x265   : > { %v1780_v38 = vmax.f32 %v1524_v36, 0.0 }
 0x266   : > { %v1781_v39 = vmax.f32 %v1526_v25, 0.0 }
 0x267   : > { %v1950_v40 = vpack.c.bf16 %v1780_v38, %v1778_v34 }
 0x268   : > { %v1951_v44 = vpack.c.bf16 %v1781_v39, %v1779_v62  ;;  %v1529_v41 = vpop.f32.mrb[44].mxu1 }
 0x269   : > { %v1530_v47 = vadd.f32 %v1529_v41, %v986_v43  ;;  %v1531_v52 = vpop.f32.mrb[45].mxu1 }
 0x26a   : > { %v1532_v49 = vadd.f32 %v1531_v52, %v986_v43  ;;  %v1533_v30 = vpop.f32.mrb[46].mxu1  ;;  %2526 = vmatprep.subr.bf16.mxu0 %v1951_v44  ;;  %v1026_v43 = vpop.permute.xlu0 %1025 }
 0x26b   : > { %v1534_v56 = vadd.f32 %v1533_v30, %v991_v50  ;;  %v1535_v1 = vpop.f32.mrb[47].mxu1  ;;  %2527 = vmatpush1.bf16.msra.mxu0 %v1950_v40  ;;  %v1782_v54 = vmax.f32 %v1530_v47, 0.0 }
 0x26c   : > { %v1536_v45 = vadd.f32 %v1535_v1, %v991_v50  ;;  %v1783_v57 = vmax.f32 %v1532_v49, 0.0  ;;  %v1031_v50 = vpop.permute.xlu1 %1030 }
 0x26d   : > { %v1784_v32 = vmax.f32 %v1534_v56, 0.0 }
 0x26e   : > { %v1785_v59 = vmax.f32 %v1536_v45, 0.0 }
 0x26f   : > { %v1952_v5 = vpack.c.bf16 %v1784_v32, %v1782_v54 }
 0x270   : > { %v1953_v63 = vpack.c.bf16 %v1785_v59, %v1783_v57  ;;  %v1539_v0 = vpop.f32.mrb[48].mxu1 }
 0x271   : > { %v1540_v2 = vadd.f32 %v1539_v0, %v996_v60  ;;  %v1541_v4 = vpop.f32.mrb[49].mxu1 }
 0x272   : > { %v1542_v10 = vadd.f32 %v1541_v4, %v996_v60  ;;  %v1543_v46 = vpop.f32.mrb[50].mxu1  ;;  %2528 = vmatprep.subr.bf16.mxu0 %v1953_v63  ;;  %v1036_v60 = vpop.permute.xlu0 %1035 }
 0x273   : > { %v1544_v42 = vadd.f32 %v1543_v46, %v1001_v6  ;;  %v1545_v55 = vpop.f32.mrb[51].mxu1  ;;  %2529 = vmatpush1.bf16.msra.mxu0 %v1952_v5  ;;  %v1786_v8 = vmax.f32 %v1540_v2, 0.0 }
 0x274   : > { %v1546_v13 = vadd.f32 %v1545_v55, %v1001_v6  ;;  %v1787_v14 = vmax.f32 %v1542_v10, 0.0  ;;  %v1041_v6 = vpop.permute.xlu1 %1040 }
 0x275   : > { %v1788_v53 = vmax.f32 %v1544_v42, 0.0  ;;  %v3721_v42 = vld [vmem:[%s4958_s5] ss:$16 sps:$4 sm:$0xff]  }
 0x276   : > { %v1789_v16 = vmax.f32 %v1546_v13, 0.0 }
 0x277   : > { %v1954_v3 = vpack.c.bf16 %v1788_v53, %v1786_v8  ;;  %v3724_v8 = vld [vmem:[%s4958_s5 + $0x24] ss:$16 sps:$4 sm:$0xff]  }
 0x278   : > { %v1955_v9 = vpack.c.bf16 %v1789_v16, %v1787_v14  ;;  %v1549_v18 = vpop.f32.mrb[52].mxu1 }
 0x279   : > { %v1550_v48 = vadd.f32 %v1549_v18, %v1006_v17  ;;  %v1551_v58 = vpop.f32.mrb[53].mxu1  ;;  %v1046_v18 = vpop.permute.xlu0 %1045 }
 0x27a   : > { %v1552_v21 = vadd.f32 %v1551_v58, %v1006_v17  ;;  %v1553_v19 = vpop.f32.mrb[54].mxu1  ;;  %2530 = vmatprep.subr.bf16.mxu0 %v1955_v9 }
 0x27b   : > { %v1554_v23 = vadd.f32 %v1553_v19, %v1011_v20  ;;  %v1555_v7 = vpop.f32.mrb[55].mxu1  ;;  %2531 = vmatpush1.bf16.msra.mxu0 %v1954_v3  ;;  %v1790_v26 = vmax.f32 %v1550_v48, 0.0  ;;  %v1051_v19 = vpop.permute.xlu1 %1050 }
 0x27c   : > { %v1556_v24 = vadd.f32 %v1555_v7, %v1011_v20  ;;  %v1791_v11 = vmax.f32 %v1552_v21, 0.0 }
 0x27d   : > { %v1792_v12 = vmax.f32 %v1554_v23, 0.0 }
 0x27e   : > { %v1793_v15 = vmax.f32 %v1556_v24, 0.0  ;;  %v3726_v24 = vld [vmem:[%s4958_s5 + $0x20] ss:$16 sps:$4 sm:$0xff]  }
 0x27f   : > { %v1956_v27 = vpack.c.bf16 %v1792_v12, %v1790_v26 }
 0x280   : > { %v1957_v31 = vpack.c.bf16 %v1793_v15, %v1791_v11  ;;  %v1559_v33 = vpop.f32.mrb[56].mxu1  ;;  %v3727_v11 = vld [vmem:[%s4958_s5 + $0x44] ss:$16 sps:$4 sm:$0xff]  }
 0x281   : > { %v1560_v35 = vadd.f32 %v1559_v33, %v1016_v29  ;;  %v1561_v51 = vpop.f32.mrb[57].mxu1 }
 0x282   : > { %v1562_v61 = vadd.f32 %v1561_v51, %v1016_v29  ;;  %v1563_v28 = vpop.f32.mrb[58].mxu1  ;;  %2532 = vmatprep.subr.bf16.mxu0 %v1957_v31  ;;  %v1056_v51 = vpop.permute.xlu0 %1055 }
 0x283   : > { %v1564_v36 = vadd.f32 %v1563_v28, %v1021_v22  ;;  %v1565_v37 = vpop.f32.mrb[59].mxu1  ;;  %2533 = vmatpush1.bf16.msra.mxu0 %v1956_v27  ;;  %v1794_v34 = vmax.f32 %v1560_v35, 0.0 }
 0x284   : > { %v1566_v25 = vadd.f32 %v1565_v37, %v1021_v22  ;;  %v1795_v62 = vmax.f32 %v1562_v61, 0.0  ;;  %v1061_v37 = vpop.permute.xlu1 %1060 }
 0x285   : > { %v1796_v38 = vmax.f32 %v1564_v36, 0.0 }
 0x286   : > { %v1797_v39 = vmax.f32 %v1566_v25, 0.0 }
 0x287   : > { %v1958_v40 = vpack.c.bf16 %v1796_v38, %v1794_v34  ;;  %v3729_v38 = vld [vmem:[%s4958_s5 + $0x40] ss:$16 sps:$4 sm:$0xff]  }
 0x288   : > { %v1959_v44 = vpack.c.bf16 %v1797_v39, %v1795_v62  ;;  %v1569_v41 = vpop.f32.mrb[60].mxu1 }
 0x289   : > { %v1570_v47 = vadd.f32 %v1569_v41, %v1026_v43  ;;  %v1571_v52 = vpop.f32.mrb[61].mxu1 }
 0x28a   : > { %v1572_v49 = vadd.f32 %v1571_v52, %v1026_v43  ;;  %v1573_v30 = vpop.f32.mrb[62].mxu1  ;;  %2534 = vmatprep.subr.bf16.mxu0 %v1959_v44 }
 0x28b   : > { %v1574_v56 = vadd.f32 %v1573_v30, %v1031_v50  ;;  %v1575_v1 = vpop.f32.mrb[63].mxu1  ;;  %2535 = vmatpush1.bf16.msra.mxu0 %v1958_v40  ;;  %v1798_v54 = vmax.f32 %v1570_v47, 0.0  ;;  %v3730_v40 = vld [vmem:[%s4958_s5 + $0x64] ss:$16 sps:$4 sm:$0xff]  }
 0x28c   : > { %v1576_v45 = vadd.f32 %v1575_v1, %v1031_v50  ;;  %v1799_v57 = vmax.f32 %v1572_v49, 0.0  ;;  %v1066_v49 = vpop.permute.xlu0 %1065 }
 0x28d   : > { %v1800_v32 = vmax.f32 %v1574_v56, 0.0 }
 0x28e   : > { %v1801_v59 = vmax.f32 %v1576_v45, 0.0 }
 0x28f   : > { %v1960_v5 = vpack.c.bf16 %v1800_v32, %v1798_v54  ;;  %v1071_v54 = vpop.permute.xlu1 %1070 }
 0x290   : > { %v1961_v63 = vpack.c.bf16 %v1801_v59, %v1799_v57  ;;  %v1579_v0 = vpop.f32.mrb[64].mxu1  ;;  %v3732_v59 = vld [vmem:[%s4958_s5 + $0x60] ss:$16 sps:$4 sm:$0xff]  }
 0x291   : > { %v1580_v2 = vadd.f32 %v1579_v0, %v1036_v60  ;;  %v1581_v4 = vpop.f32.mrb[65].mxu1 }
 0x292   : > { %v1582_v10 = vadd.f32 %v1581_v4, %v1036_v60  ;;  %v1583_v46 = vpop.f32.mrb[66].mxu1  ;;  %2536 = vmatprep.subr.bf16.mxu0 %v1961_v63  ;;  %v3733_v63 = vld [vmem:[%s4958_s5 + $0x84] ss:$16 sps:$4 sm:$0xff]  }
 0x293   : > { %v1584_v55 = vadd.f32 %v1583_v46, %v1041_v6  ;;  %v1585_v13 = vpop.f32.mrb[67].mxu1  ;;  %2537 = vmatpush1.bf16.msra.mxu0 %v1960_v5  ;;  %v1802_v14 = vmax.f32 %v1580_v2, 0.0 }
 0x294   : > { %v1586_v53 = vadd.f32 %v1585_v13, %v1041_v6  ;;  %v1803_v3 = vmax.f32 %v1582_v10, 0.0 }
 0x295   : > { %v1804_v16 = vmax.f32 %v1584_v55, 0.0 }
 0x296   : > { %v1805_v17 = vmax.f32 %v1586_v53, 0.0  ;;  %2539 = vmatmul.mubr.bf16.vlgmr.msra.gmra.mrb[32].mxu0 %v3721_v42  ;;  %v1076_v42 = vpop.permute.xlu0 %1075 }
 0x297   : > { %v1962_v9 = vpack.c.bf16 %v1804_v16, %v1802_v14  ;;  %2548 = vmatprep.mubr.bf16.mxu0 %v3724_v8  ;;  %v1081_v14 = vpop.permute.xlu1 %1080 }
 0x298   : > { %v1963_v48 = vpack.c.bf16 %v1805_v17, %v1803_v3  ;;  %v1589_v58 = vpop.f32.mrb[68].mxu1  ;;  %v3735_v17 = vld [vmem:[%s4958_s5 + $0x80] ss:$16 sps:$4 sm:$0xff]  }
 0x299   : > { %v1590_v20 = vadd.f32 %v1589_v58, %v1046_v18  ;;  %v1591_v21 = vpop.f32.mrb[69].mxu1 }
 0x29a   : > { %v1592_v23 = vadd.f32 %v1591_v21, %v1046_v18  ;;  %v1593_v7 = vpop.f32.mrb[70].mxu1  ;;  %2699 = vmatprep.subr.bf16.mxu0 %v1963_v48  ;;  %v3736_v48 = vld [vmem:[%s4958_s5 + $0xa4] ss:$16 sps:$4 sm:$0xff]  }
 0x29b   : > { %v1594_v26 = vadd.f32 %v1593_v7, %v1051_v19  ;;  %v1595_v12 = vpop.f32.mrb[71].mxu1  ;;  %2700 = vmatpush1.bf16.msra.mxu0 %v1962_v9  ;;  %v1806_v27 = vmax.f32 %v1590_v20, 0.0 }
 0x29c   : > { %v1596_v15 = vadd.f32 %v1595_v12, %v1051_v19  ;;  %v1807_v31 = vmax.f32 %v1592_v23, 0.0 }
 0x29d   : > { %v1808_v29 = vmax.f32 %v1594_v26, 0.0 }
 0x29e   : > { %v1809_v33 = vmax.f32 %v1596_v15, 0.0  ;;  %2549 = vmatmul.mubr.bf16.gmra.mrb[36].mxu0 %v3726_v24  ;;  %v1086_v24 = vpop.permute.xlu0 %1085 }
 0x29f   : > { %v1964_v35 = vpack.c.bf16 %v1808_v29, %v1806_v27  ;;  %2558 = vmatprep.mubr.bf16.mxu0 %v3727_v11  ;;  %v1091_v27 = vpop.permute.xlu1 %1090 }
 0x2a0   : > { %v1965_v22 = vpack.c.bf16 %v1809_v33, %v1807_v31  ;;  %v1599_v61 = vpop.f32.mrb[72].mxu1  ;;  %v3738_v33 = vld [vmem:[%s4958_s5 + $0xa0] ss:$16 sps:$4 sm:$0xff]  }
 0x2a1   : > { %v1600_v28 = vadd.f32 %v1599_v61, %v1056_v51  ;;  %v1601_v36 = vpop.f32.mrb[73].mxu1 }
 0x2a2   : > { %v1602_v25 = vadd.f32 %v1601_v36, %v1056_v51  ;;  %v1603_v34 = vpop.f32.mrb[74].mxu1  ;;  %2701 = vmatprep.subr.bf16.mxu0 %v1965_v22  ;;  %v3739_v22 = vld [vmem:[%s4958_s5 + $0xc4] ss:$16 sps:$4 sm:$0xff]  }
 0x2a3   : > { %v1604_v62 = vadd.f32 %v1603_v34, %v1061_v37  ;;  %v1605_v39 = vpop.f32.mrb[75].mxu1  ;;  %2702 = vmatpush1.bf16.msra.mxu0 %v1964_v35  ;;  %v1810_v44 = vmax.f32 %v1600_v28, 0.0 }
 0x2a4   : > { %v1606_v43 = vadd.f32 %v1605_v39, %v1061_v37  ;;  %v1811_v47 = vmax.f32 %v1602_v25, 0.0 }
 0x2a5   : > { %v1812_v41 = vmax.f32 %v1604_v62, 0.0 }
 0x2a6   : > { %v1813_v52 = vmax.f32 %v1606_v43, 0.0  ;;  %2559 = vmatmul.mubr.bf16.gmra.mrb[40].mxu0 %v3729_v38  ;;  %v1096_v38 = vpop.permute.xlu0 %1095 }
 0x2a7   : > { %v1966_v50 = vpack.c.bf16 %v1812_v41, %v1810_v44  ;;  %2568 = vmatprep.mubr.bf16.mxu0 %v3730_v40  ;;  %v1101_v44 = vpop.permute.xlu1 %1100 }
 0x2a8   : > { %v1967_v30 = vpack.c.bf16 %v1813_v52, %v1811_v47  ;;  %v1609_v56 = vpop.f32.mrb[76].mxu1  ;;  %v3741_v52 = vld [vmem:[%s4958_s5 + $0xc0] ss:$16 sps:$4 sm:$0xff]  }
 0x2a9   : > { %v1610_v1 = vadd.f32 %v1609_v56, %v1066_v49  ;;  %v1611_v45 = vpop.f32.mrb[77].mxu1 }
 0x2aa   : > { %v1612_v32 = vadd.f32 %v1611_v45, %v1066_v49  ;;  %v1613_v57 = vpop.f32.mrb[78].mxu1  ;;  %2703 = vmatprep.subr.bf16.mxu0 %v1967_v30  ;;  %v3742_v30 = vld [vmem:[%s4958_s5 + $0xe4] ss:$16 sps:$4 sm:$0xff]  }
 0x2ab   : > { %v1614_v5 = vadd.f32 %v1613_v57, %v1071_v54  ;;  %v1615_v60 = vpop.f32.mrb[79].mxu1  ;;  %2704 = vmatpush1.bf16.msra.mxu0 %v1966_v50  ;;  %v1814_v2 = vmax.f32 %v1610_v1, 0.0 }
 0x2ac   : > { %v1616_v0 = vadd.f32 %v1615_v60, %v1071_v54  ;;  %v1815_v6 = vmax.f32 %v1612_v32, 0.0 }
 0x2ad   : > { %v1816_v4 = vmax.f32 %v1614_v5, 0.0 }
 0x2ae   : > { %v1817_v10 = vmax.f32 %v1616_v0, 0.0  ;;  %2569 = vmatmul.mubr.bf16.gmra.mrb[44].mxu0 %v3732_v59  ;;  %v1106_v59 = vpop.permute.xlu0 %1105 }
 0x2af   : > { %v1968_v46 = vpack.c.bf16 %v1816_v4, %v1814_v2  ;;  %2578 = vmatprep.mubr.bf16.mxu0 %v3733_v63  ;;  %v1111_v2 = vpop.permute.xlu1 %1110 }
 0x2b0   : > { %v1969_v55 = vpack.c.bf16 %v1817_v10, %v1815_v6  ;;  %v1619_v13 = vpop.f32.mrb[80].mxu1  ;;  %v3744_v10 = vld [vmem:[%s4958_s5 + $0xe0] ss:$16 sps:$4 sm:$0xff]  }
 0x2b1   : > { %v1620_v8 = vadd.f32 %v1619_v13, %v1076_v42  ;;  %v1621_v53 = vpop.f32.mrb[81].mxu1 }
 0x2b2   : > { %v1622_v16 = vadd.f32 %v1621_v53, %v1076_v42  ;;  %v1623_v3 = vpop.f32.mrb[82].mxu1  ;;  %2705 = vmatprep.subr.bf16.mxu0 %v1969_v55  ;;  %v3745_v55 = vld [vmem:[%s4958_s5 + $0x104] ss:$16 sps:$4 sm:$0xff]  }
 0x2b3   : > { %v1624_v9 = vadd.f32 %v1623_v3, %v1081_v14  ;;  %v1625_v18 = vpop.f32.mrb[83].mxu1  ;;  %2706 = vmatpush1.bf16.msra.mxu0 %v1968_v46  ;;  %v1818_v20 = vmax.f32 %v1620_v8, 0.0 }
 0x2b4   : > { %v1626_v58 = vadd.f32 %v1625_v18, %v1081_v14  ;;  %v1819_v19 = vmax.f32 %v1622_v16, 0.0 }
 0x2b5   : > { %v1820_v21 = vmax.f32 %v1624_v9, 0.0 }
 0x2b6   : > { %v1821_v23 = vmax.f32 %v1626_v58, 0.0  ;;  %2579 = vmatmul.mubr.bf16.gmra.mrb[48].mxu0 %v3735_v17  ;;  %v1116_v17 = vpop.permute.xlu0 %1115 }
 0x2b7   : > { %v1970_v7 = vpack.c.bf16 %v1820_v21, %v1818_v20  ;;  %2588 = vmatprep.mubr.bf16.mxu0 %v3736_v48  ;;  %v1121_v20 = vpop.permute.xlu1 %1120 }
 0x2b8   : > { %v1971_v26 = vpack.c.bf16 %v1821_v23, %v1819_v19  ;;  %v1629_v12 = vpop.f32.mrb[84].mxu1  ;;  %v3747_v23 = vld [vmem:[%s4958_s5 + $0x100] ss:$16 sps:$4 sm:$0xff]  }
 0x2b9   : > { %v1630_v11 = vadd.f32 %v1629_v12, %v1086_v24  ;;  %v1631_v15 = vpop.f32.mrb[85].mxu1 }
 0x2ba   : > { %v1632_v29 = vadd.f32 %v1631_v15, %v1086_v24  ;;  %v1633_v31 = vpop.f32.mrb[86].mxu1  ;;  %2707 = vmatprep.subr.bf16.mxu0 %v1971_v26  ;;  %v3748_v26 = vld [vmem:[%s4958_s5 + $0x124] ss:$16 sps:$4 sm:$0xff]  }
 0x2bb   : > { %v1634_v35 = vadd.f32 %v1633_v31, %v1091_v27  ;;  %v1635_v51 = vpop.f32.mrb[87].mxu1  ;;  %2708 = vmatpush1.bf16.msra.mxu0 %v1970_v7  ;;  %v1822_v28 = vmax.f32 %v1630_v11, 0.0 }
 0x2bc   : > { %v1636_v61 = vadd.f32 %v1635_v51, %v1091_v27  ;;  %v1823_v37 = vmax.f32 %v1632_v29, 0.0 }
 0x2bd   : > { %v1824_v36 = vmax.f32 %v1634_v35, 0.0 }
 0x2be   : > { %v1825_v25 = vmax.f32 %v1636_v61, 0.0  ;;  %2589 = vmatmul.mubr.bf16.gmra.mrb[52].mxu0 %v3738_v33  ;;  %v1126_v33 = vpop.permute.xlu0 %1125 }
 0x2bf   : > { %v1972_v34 = vpack.c.bf16 %v1824_v36, %v1822_v28  ;;  %2598 = vmatprep.mubr.bf16.mxu0 %v3739_v22  ;;  %v1131_v28 = vpop.permute.xlu1 %1130 }
 0x2c0   : > { %v1973_v62 = vpack.c.bf16 %v1825_v25, %v1823_v37  ;;  %v1639_v39 = vpop.f32.mrb[88].mxu1  ;;  %v3750_v25 = vld [vmem:[%s4958_s5 + $0x120] ss:$16 sps:$4 sm:$0xff]  }
 0x2c1   : > { %v1640_v40 = vadd.f32 %v1639_v39, %v1096_v38  ;;  %v1641_v43 = vpop.f32.mrb[89].mxu1 }
 0x2c2   : > { %v1642_v41 = vadd.f32 %v1641_v43, %v1096_v38  ;;  %v1643_v47 = vpop.f32.mrb[90].mxu1  ;;  %2709 = vmatprep.subr.bf16.mxu0 %v1973_v62  ;;  %v3751_v62 = vld [vmem:[%s4958_s5 + $0x144] ss:$16 sps:$4 sm:$0xff]  }
 0x2c3   : > { %v1644_v50 = vadd.f32 %v1643_v47, %v1101_v44  ;;  %v1645_v49 = vpop.f32.mrb[91].mxu1  ;;  %2710 = vmatpush1.bf16.msra.mxu0 %v1972_v34  ;;  %v1826_v1 = vmax.f32 %v1640_v40, 0.0 }
 0x2c4   : > { %v1646_v56 = vadd.f32 %v1645_v49, %v1101_v44  ;;  %v1827_v54 = vmax.f32 %v1642_v41, 0.0 }
 0x2c5   : > { %v1828_v45 = vmax.f32 %v1644_v50, 0.0 }
 0x2c6   : > { %v1829_v32 = vmax.f32 %v1646_v56, 0.0  ;;  %2599 = vmatmul.mubr.bf16.gmra.mrb[56].mxu0 %v3741_v52  ;;  %v1136_v52 = vpop.permute.xlu0 %1135 }
 0x2c7   : > { %v1974_v57 = vpack.c.bf16 %v1828_v45, %v1826_v1  ;;  %2608 = vmatprep.mubr.bf16.mxu0 %v3742_v30  ;;  %v1141_v1 = vpop.permute.xlu1 %1140 }
 0x2c8   : > { %v1975_v5 = vpack.c.bf16 %v1829_v32, %v1827_v54  ;;  %v1649_v60 = vpop.f32.mrb[92].mxu1  ;;  %v3753_v32 = vld [vmem:[%s4958_s5 + $0x140] ss:$16 sps:$4 sm:$0xff]  }
 0x2c9   : > { %v1650_v63 = vadd.f32 %v1649_v60, %v1106_v59  ;;  %v1651_v0 = vpop.f32.mrb[93].mxu1 }
 0x2ca   : > { %v1652_v4 = vadd.f32 %v1651_v0, %v1106_v59  ;;  %v1653_v6 = vpop.f32.mrb[94].mxu1  ;;  %2711 = vmatprep.subr.bf16.mxu0 %v1975_v5  ;;  %v3754_v5 = vld [vmem:[%s4958_s5 + $0x164] ss:$16 sps:$4 sm:$0xff]  }
 0x2cb   : > { %v1654_v46 = vadd.f32 %v1653_v6, %v1111_v2  ;;  %v1655_v42 = vpop.f32.mrb[95].mxu1  ;;  %2712 = vmatpush1.bf16.msra.mxu0 %v1974_v57  ;;  %v1830_v8 = vmax.f32 %v1650_v63, 0.0 }
 0x2cc   : > { %v1656_v13 = vadd.f32 %v1655_v42, %v1111_v2  ;;  %v1831_v14 = vmax.f32 %v1652_v4, 0.0 }
 0x2cd   : > { %v1832_v53 = vmax.f32 %v1654_v46, 0.0 }
 0x2ce   : > { %v1833_v16 = vmax.f32 %v1656_v13, 0.0  ;;  %2609 = vmatmul.mubr.bf16.gmra.mrb[60].mxu0 %v3744_v10  ;;  %v1146_v10 = vpop.permute.xlu0 %1145 }
 0x2cf   : > { %v1976_v3 = vpack.c.bf16 %v1832_v53, %v1830_v8  ;;  %2618 = vmatprep.mubr.bf16.mxu0 %v3745_v55  ;;  %v1151_v8 = vpop.permute.xlu1 %1150 }
 0x2d0   : > { %v1977_v9 = vpack.c.bf16 %v1833_v16, %v1831_v14  ;;  %v1659_v18 = vpop.f32.mrb[96].mxu1  ;;  %v3756_v16 = vld [vmem:[%s4958_s5 + $0x160] ss:$16 sps:$4 sm:$0xff]  }
 0x2d1   : > { %v1660_v48 = vadd.f32 %v1659_v18, %v1116_v17  ;;  %v1661_v58 = vpop.f32.mrb[97].mxu1 }
 0x2d2   : > { %v1662_v21 = vadd.f32 %v1661_v58, %v1116_v17  ;;  %v1663_v19 = vpop.f32.mrb[98].mxu1  ;;  %2713 = vmatprep.subr.bf16.mxu0 %v1977_v9  ;;  %v3757_v9 = vld [vmem:[%s4958_s5 + $0x184] ss:$16 sps:$4 sm:$0xff]  }
 0x2d3   : > { %v1664_v7 = vadd.f32 %v1663_v19, %v1121_v20  ;;  %v1665_v24 = vpop.f32.mrb[99].mxu1  ;;  %2714 = vmatpush1.bf16.msra.mxu0 %v1976_v3  ;;  %v1834_v11 = vmax.f32 %v1660_v48, 0.0 }
 0x2d4   : > { %v1666_v12 = vadd.f32 %v1665_v24, %v1121_v20  ;;  %v1835_v27 = vmax.f32 %v1662_v21, 0.0 }
 0x2d5   : > { %v1836_v15 = vmax.f32 %v1664_v7, 0.0 }
 0x2d6   : > { %v1837_v29 = vmax.f32 %v1666_v12, 0.0  ;;  %2619 = vmatmul.mubr.bf16.gmra.mrb[64].mxu0 %v3747_v23  ;;  %v1156_v23 = vpop.permute.xlu0 %1155 }
 0x2d7   : > { %v1978_v31 = vpack.c.bf16 %v1836_v15, %v1834_v11  ;;  %2628 = vmatprep.mubr.bf16.mxu0 %v3748_v26  ;;  %v1161_v11 = vpop.permute.xlu1 %1160 }
 0x2d8   : > { %v1979_v35 = vpack.c.bf16 %v1837_v29, %v1835_v27  ;;  %v1669_v51 = vpop.f32.mrb[100].mxu1  ;;  %v3759_v29 = vld [vmem:[%s4958_s5 + $0x180] ss:$16 sps:$4 sm:$0xff]  }
 0x2d9   : > { %v1670_v22 = vadd.f32 %v1669_v51, %v1126_v33  ;;  %v1671_v61 = vpop.f32.mrb[101].mxu1 }
 0x2da   : > { %v1672_v36 = vadd.f32 %v1671_v61, %v1126_v33  ;;  %v1673_v37 = vpop.f32.mrb[102].mxu1  ;;  %2715 = vmatprep.subr.bf16.mxu0 %v1979_v35  ;;  %v3760_v35 = vld [vmem:[%s4958_s5 + $0x1a4] ss:$16 sps:$4 sm:$0xff]  }
 0x2db   : > { %v1674_v34 = vadd.f32 %v1673_v37, %v1131_v28  ;;  %v1675_v38 = vpop.f32.mrb[103].mxu1  ;;  %2716 = vmatpush1.bf16.msra.mxu0 %v1978_v31  ;;  %v1838_v40 = vmax.f32 %v1670_v22, 0.0 }
 0x2dc   : > { %v1676_v39 = vadd.f32 %v1675_v38, %v1131_v28  ;;  %v1839_v44 = vmax.f32 %v1672_v36, 0.0 }
 0x2dd   : > { %v1840_v43 = vmax.f32 %v1674_v34, 0.0 }
 0x2de   : > { %v1841_v41 = vmax.f32 %v1676_v39, 0.0  ;;  %2629 = vmatmul.mubr.bf16.gmra.mrb[68].mxu0 %v3750_v25  ;;  %v1166_v25 = vpop.permute.xlu0 %1165 }
 0x2df   : > { %v1980_v47 = vpack.c.bf16 %v1840_v43, %v1838_v40  ;;  %2638 = vmatprep.mubr.bf16.mxu0 %v3751_v62  ;;  %v1171_v40 = vpop.permute.xlu1 %1170 }
 0x2e0   : > { %v1981_v50 = vpack.c.bf16 %v1841_v41, %v1839_v44  ;;  %v1679_v49 = vpop.f32.mrb[104].mxu1  ;;  %v3762_v41 = vld [vmem:[%s4958_s5 + $0x1a0] ss:$16 sps:$4 sm:$0xff]  }
 0x2e1   : > { %v1680_v30 = vadd.f32 %v1679_v49, %v1136_v52  ;;  %v1681_v56 = vpop.f32.mrb[105].mxu1 }
 0x2e2   : > { %v1682_v45 = vadd.f32 %v1681_v56, %v1136_v52  ;;  %v1683_v54 = vpop.f32.mrb[106].mxu1  ;;  %2717 = vmatprep.subr.bf16.mxu0 %v1981_v50  ;;  %v3763_v50 = vld [vmem:[%s4958_s5 + $0x1c4] ss:$16 sps:$4 sm:$0xff]  }
 0x2e3   : > { %v1684_v57 = vadd.f32 %v1683_v54, %v1141_v1  ;;  %v1685_v59 = vpop.f32.mrb[107].mxu1  ;;  %2718 = vmatpush1.bf16.msra.mxu0 %v1980_v47  ;;  %v1842_v63 = vmax.f32 %v1680_v30, 0.0 }
 0x2e4   : > { %v1686_v60 = vadd.f32 %v1685_v59, %v1141_v1  ;;  %v1843_v2 = vmax.f32 %v1682_v45, 0.0 }
 0x2e5   : > { %v1844_v0 = vmax.f32 %v1684_v57, 0.0 }
 0x2e6   : > { %v1845_v4 = vmax.f32 %v1686_v60, 0.0  ;;  %2639 = vmatmul.mubr.bf16.gmra.mrb[72].mxu0 %v3753_v32  ;;  %v1176_v32 = vpop.permute.xlu0 %1175 }
 0x2e7   : > { %v1982_v6 = vpack.c.bf16 %v1844_v0, %v1842_v63  ;;  %2648 = vmatprep.mubr.bf16.mxu0 %v3754_v5  ;;  %v1181_v63 = vpop.permute.xlu1 %1180 }
 0x2e8   : > { %v1983_v46 = vpack.c.bf16 %v1845_v4, %v1843_v2  ;;  %v1689_v42 = vpop.f32.mrb[108].mxu1  ;;  %v3765_v4 = vld [vmem:[%s4958_s5 + $0x1c0] ss:$16 sps:$4 sm:$0xff]  }
 0x2e9   : > { %v1690_v55 = vadd.f32 %v1689_v42, %v1146_v10  ;;  %v1691_v13 = vpop.f32.mrb[109].mxu1 }
 0x2ea   : > { %v1692_v53 = vadd.f32 %v1691_v13, %v1146_v10  ;;  %v1693_v14 = vpop.f32.mrb[110].mxu1  ;;  %2719 = vmatprep.subr.bf16.mxu0 %v1983_v46  ;;  %v3766_v46 = vld [vmem:[%s4958_s5 + $0x1e4] ss:$16 sps:$4 sm:$0xff]  }
 0x2eb   : > { %v1694_v3 = vadd.f32 %v1693_v14, %v1151_v8  ;;  %v1695_v17 = vpop.f32.mrb[111].mxu1  ;;  %2720 = vmatpush1.bf16.msra.mxu0 %v1982_v6  ;;  %v1846_v48 = vmax.f32 %v1690_v55, 0.0 }
 0x2ec   : > { %v1696_v18 = vadd.f32 %v1695_v17, %v1151_v8  ;;  %v1847_v20 = vmax.f32 %v1692_v53, 0.0 }
 0x2ed   : > { %v1848_v58 = vmax.f32 %v1694_v3, 0.0 }
 0x2ee   : > { %v1849_v21 = vmax.f32 %v1696_v18, 0.0  ;;  %2649 = vmatmul.mubr.bf16.gmra.mrb[76].mxu0 %v3756_v16  ;;  %v1186_v16 = vpop.permute.xlu0 %1185 }
 0x2ef   : > { %v1984_v19 = vpack.c.bf16 %v1848_v58, %v1846_v48  ;;  %2658 = vmatprep.mubr.bf16.mxu0 %v3757_v9  ;;  %v1191_v48 = vpop.permute.xlu1 %1190 }
 0x2f0   : > { %v1985_v7 = vpack.c.bf16 %v1849_v21, %v1847_v20  ;;  %v1699_v24 = vpop.f32.mrb[112].mxu1  ;;  %v3768_v21 = vld [vmem:[%s4958_s5 + $0x1e0] ss:$16 sps:$4 sm:$0xff]  }
 0x2f1   : > { %v1700_v26 = vadd.f32 %v1699_v24, %v1156_v23  ;;  %v1701_v12 = vpop.f32.mrb[113].mxu1 }
 0x2f2   : > { %v1702_v15 = vadd.f32 %v1701_v12, %v1156_v23  ;;  %v1703_v27 = vpop.f32.mrb[114].mxu1  ;;  %2721 = vmatprep.subr.bf16.mxu0 %v1985_v7  ;;  %v3771_v7 = vld [vmem:[%s4958_s5 + $0xc] ss:$16 sps:$4 sm:$0xff]  }
 0x2f3   : > { %v1704_v31 = vadd.f32 %v1703_v27, %v1161_v11  ;;  %v1705_v33 = vpop.f32.mrb[115].mxu1  ;;  %2722 = vmatpush1.bf16.msra.mxu0 %v1984_v19  ;;  %v1850_v22 = vmax.f32 %v1700_v26, 0.0 }
 0x2f4   : > { %v1706_v51 = vadd.f32 %v1705_v33, %v1161_v11  ;;  %v1851_v28 = vmax.f32 %v1702_v15, 0.0  ;;  %v3772_v33 = vld [vmem:[%s4958_s5 + $0x2c] ss:$16 sps:$4 sm:$0xff]  }
 0x2f5   : > { %v1852_v61 = vmax.f32 %v1704_v31, 0.0  ;;  %v3769_v31 = vld [vmem:[%s4958_s5 + $0x8] ss:$16 sps:$4 sm:$0xff]  }
 0x2f6   : > { %v1853_v36 = vmax.f32 %v1706_v51, 0.0  ;;  %2659 = vmatmul.mubr.bf16.gmra.mrb[80].mxu0 %v3759_v29  ;;  %v3775_v51 = vld [vmem:[%s4958_s5 + $0x4c] ss:$16 sps:$4 sm:$0xff]  }
 0x2f7   : > { %v1986_v37 = vpack.c.bf16 %v1852_v61, %v1850_v22  ;;  %2668 = vmatprep.mubr.bf16.mxu0 %v3760_v35  ;;  %v3774_v35 = vld [vmem:[%s4958_s5 + $0x28] ss:$16 sps:$4 sm:$0xff]   ;;  %v3778_v61 = vld [vmem:[%s4958_s5 + $0x6c] ss:$16 sps:$4 sm:$0xff]  }
 0x2f8   : > { %v1987_v34 = vpack.c.bf16 %v1853_v36, %v1851_v28  ;;  %v1709_v38 = vpop.f32.mrb[116].mxu1  ;;  %v3777_v22 = vld [vmem:[%s4958_s5 + $0x48] ss:$16 sps:$4 sm:$0xff]   ;;  %v3781_v36 = vld [vmem:[%s4958_s5 + $0x8c] ss:$16 sps:$4 sm:$0xff]  }
 0x2f9   : > { %v1710_v62 = vadd.f32 %v1709_v38, %v1166_v25  ;;  %v1711_v39 = vpop.f32.mrb[117].mxu1  ;;  %v3780_v28 = vld [vmem:[%s4958_s5 + $0x68] ss:$16 sps:$4 sm:$0xff]   ;;  %v3787_v38 = vld [vmem:[%s4958_s5 + $0xcc] ss:$16 sps:$4 sm:$0xff]  }
 0x2fa   : > { %v1712_v43 = vadd.f32 %v1711_v39, %v1166_v25  ;;  %v1713_v44 = vpop.f32.mrb[118].mxu1  ;;  %2723 = vmatprep.subr.bf16.mxu0 %v1987_v34  ;;  %v3784_v25 = vld [vmem:[%s4958_s5 + $0xac] ss:$16 sps:$4 sm:$0xff]   ;;  %v3786_v34 = vld [vmem:[%s4958_s5 + $0xa8] ss:$16 sps:$4 sm:$0xff]  }
 0x2fb   : > { %v1714_v47 = vadd.f32 %v1713_v44, %v1171_v40  ;;  %v1715_v52 = vpop.f32.mrb[119].mxu1  ;;  %2724 = vmatpush1.bf16.msra.mxu0 %v1986_v37  ;;  %v1854_v30 = vmax.f32 %v1710_v62, 0.0  ;;  %v3783_v37 = vld [vmem:[%s4958_s5 + $0x88] ss:$16 sps:$4 sm:$0xff]   ;;  %v3790_v39 = vld [vmem:[%s4958_s5 + $0xec] ss:$16 sps:$4 sm:$0xff]  }
 0x2fc   : > { %v1716_v49 = vadd.f32 %v1715_v52, %v1171_v40  ;;  %v1855_v1 = vmax.f32 %v1712_v43, 0.0  ;;  %v3789_v62 = vld [vmem:[%s4958_s5 + $0xc8] ss:$16 sps:$4 sm:$0xff]   ;;  %v3793_v43 = vld [vmem:[%s4958_s5 + $0x10c] ss:$16 sps:$4 sm:$0xff]  }
 0x2fd   : > { %v1856_v56 = vmax.f32 %v1714_v47, 0.0  ;;  %v3792_v40 = vld [vmem:[%s4958_s5 + $0xe8] ss:$16 sps:$4 sm:$0xff]   ;;  %v3799_v52 = vld [vmem:[%s4958_s5 + $0x14c] ss:$16 sps:$4 sm:$0xff]  }
 0x2fe   : > { %v1857_v45 = vmax.f32 %v1716_v49, 0.0  ;;  %2669 = vmatmul.mubr.bf16.gmra.mrb[84].mxu0 %v3762_v41  ;;  %v3795_v44 = vld [vmem:[%s4958_s5 + $0x108] ss:$16 sps:$4 sm:$0xff]   ;;  %v3796_v41 = vld [vmem:[%s4958_s5 + $0x12c] ss:$16 sps:$4 sm:$0xff]  }
 0x2ff   : > { %v1988_v54 = vpack.c.bf16 %v1856_v56, %v1854_v30  ;;  %2678 = vmatprep.mubr.bf16.mxu0 %v3763_v50  ;;  %v3798_v47 = vld [vmem:[%s4958_s5 + $0x128] ss:$16 sps:$4 sm:$0xff]   ;;  %v3802_v49 = vld [vmem:[%s4958_s5 + $0x16c] ss:$16 sps:$4 sm:$0xff]  }
 0x300   : > { %v1989_v57 = vpack.c.bf16 %v1857_v45, %v1855_v1  ;;  %v1719_v59 = vpop.f32.mrb[120].mxu1  ;;  %v3801_v50 = vld [vmem:[%s4958_s5 + $0x148] ss:$16 sps:$4 sm:$0xff]   ;;  %v3805_v56 = vld [vmem:[%s4958_s5 + $0x18c] ss:$16 sps:$4 sm:$0xff]  }
 0x301   : > { %v1720_v5 = vadd.f32 %v1719_v59, %v1176_v32  ;;  %v1721_v60 = vpop.f32.mrb[121].mxu1  ;;  %v3804_v30 = vld [vmem:[%s4958_s5 + $0x168] ss:$16 sps:$4 sm:$0xff]   ;;  %v3808_v45 = vld [vmem:[%s4958_s5 + $0x1ac] ss:$16 sps:$4 sm:$0xff]  }
 0x302   : > { %v1722_v0 = vadd.f32 %v1721_v60, %v1176_v32  ;;  %v1723_v2 = vpop.f32.mrb[122].mxu1  ;;  %2725 = vmatprep.subr.bf16.mxu0 %v1989_v57  ;;  %v3807_v1 = vld [vmem:[%s4958_s5 + $0x188] ss:$16 sps:$4 sm:$0xff]   ;;  %v3811_v32 = vld [vmem:[%s4958_s5 + $0x1cc] ss:$16 sps:$4 sm:$0xff]   ;;  %v2029_v60 = vpop.permute.xlu0 %2028 }
 0x303   : > { %v1724_v6 = vadd.f32 %v1723_v2, %v1181_v63  ;;  %v1725_v10 = vpop.f32.mrb[123].mxu1  ;;  %2726 = vmatpush1.bf16.msra.mxu0 %v1988_v54  ;;  %v1858_v55 = vmax.f32 %v1720_v5, 0.0  ;;  %v3810_v54 = vld [vmem:[%s4958_s5 + $0x1a8] ss:$16 sps:$4 sm:$0xff]   ;;  %v3814_v59 = vld [vmem:[%s4958_s5 + $0x1ec] ss:$16 sps:$4 sm:$0xff]  }
 0x304   : > { %v1726_v42 = vadd.f32 %v1725_v10, %v1181_v63  ;;  %v1859_v8 = vmax.f32 %v1722_v0, 0.0  ;;  %v3813_v57 = vld [vmem:[%s4958_s5 + $0x1c8] ss:$16 sps:$4 sm:$0xff]  }
 0x305   : > { %v1860_v13 = vmax.f32 %v1724_v6, 0.0  ;;  %v3816_v5 = vld [vmem:[%s4958_s5 + $0x1e8] ss:$16 sps:$4 sm:$0xff]  }
 0x306   : > { %v1861_v53 = vmax.f32 %v1726_v42, 0.0  ;;  %2679 = vmatmul.mubr.bf16.gmra.mrb[88].mxu0 %v3765_v4  ;;  %v2034_v4 = vpop.permute.xlu1 %2033 }
 0x307   : > { %v1990_v14 = vpack.c.bf16 %v1860_v13, %v1858_v55  ;;  %2688 = vmatprep.mubr.bf16.mxu0 %v3766_v46  ;;  %v3819_v55 = vld [vmem:[%s4960_s7 + $0x4] ss:$8 sps:$4 sm:$0xff]  }
 0x308   : > { %v1991_v3 = vpack.c.bf16 %v1861_v53, %v1859_v8  ;;  %v1729_v17 = vpop.f32.mrb[124].mxu1  ;;  %3116 = vmatprep.mubr.bf16.mxu1 %v3819_v55 }
 0x309   : > { %v1730_v9 = vadd.f32 %v1729_v17, %v1186_v16  ;;  %v1731_v18 = vpop.f32.mrb[125].mxu1  ;;  %v2039_v17 = vpop.permute.xlu0 %2038 }
 0x30a   : > { %v1732_v58 = vadd.f32 %v1731_v18, %v1186_v16  ;;  %v1733_v20 = vpop.f32.mrb[126].mxu1  ;;  %2727 = vmatprep.subr.bf16.mxu0 %v1991_v3 }
 0x30b   : > { %v1734_v19 = vadd.f32 %v1733_v20, %v1191_v48  ;;  %v1735_v23 = vpop.f32.mrb[127].mxu1  ;;  %2728 = vmatpush1.bf16.msra.mxu0 %v1990_v14  ;;  %v1862_v26 = vmax.f32 %v1730_v9, 0.0  ;;  %v2044_v20 = vpop.permute.xlu1 %2043 }
 0x30c   : > { %v1736_v24 = vadd.f32 %v1735_v23, %v1191_v48  ;;  %v1863_v11 = vmax.f32 %v1732_v58, 0.0 }
 0x30d   : > { %v1864_v12 = vmax.f32 %v1734_v19, 0.0 }
 0x30e   : > { %v1865_v15 = vmax.f32 %v1736_v24, 0.0  ;;  %2689 = vmatmul.mubr.bf16.gmra.mrb[92].mxu0 %v3768_v21 }
 0x30f   : > { %v1992_v27 = vpack.c.bf16 %v1864_v12, %v1862_v26  ;;  %2731 = vmatprep.mubr.bf16.mxu0 %v3771_v7 }
 0x310   : > { %v1993_v29 = vpack.c.bf16 %v1865_v15, %v1863_v11 }
 0x312   : > { %2729 = vmatprep.subr.bf16.mxu0 %v1993_v29  ;;  %v2049_v29 = vpop.permute.xlu0 %2048 }
 0x313   : > { %2730 = vmatpush1.bf16.msra.mxu0 %v1992_v27 }
 0x316   : > { %2732 = vmatmul.mubr.bf16.vlgmr.msra.gmra.mrb[32].mxu0 %v3769_v31 }
 0x317   : > { %2741 = vmatprep.mubr.bf16.mxu0 %v3772_v33 }
 0x31e   : > { %2742 = vmatmul.mubr.bf16.gmra.mrb[36].mxu0 %v3774_v35 }
 0x31f   : > { %2751 = vmatprep.mubr.bf16.mxu0 %v3775_v51 }
 0x326   : > { %2752 = vmatmul.mubr.bf16.gmra.mrb[40].mxu0 %v3777_v22  ;;  %v2054_v22 = vpop.permute.xlu1 %2053 }
 0x327   : > { %2761 = vmatprep.mubr.bf16.mxu0 %v3778_v61 }
 0x32e   : > { %2762 = vmatmul.mubr.bf16.gmra.mrb[44].mxu0 %v3780_v28 }
 0x32f   : > { %2771 = vmatprep.mubr.bf16.mxu0 %v3781_v36 }
 0x336   : > { %2772 = vmatmul.mubr.bf16.gmra.mrb[48].mxu0 %v3783_v37 }
 0x337   : > { %2781 = vmatprep.mubr.bf16.mxu0 %v3784_v25 }
 0x33e   : > { %2782 = vmatmul.mubr.bf16.gmra.mrb[52].mxu0 %v3786_v34 }
 0x33f   : > { %2791 = vmatprep.mubr.bf16.mxu0 %v3787_v38 }
 0x346   : > { %2792 = vmatmul.mubr.bf16.gmra.mrb[56].mxu0 %v3789_v62 }
 0x347   : > { %2801 = vmatprep.mubr.bf16.mxu0 %v3790_v39 }
 0x34e   : > { %2802 = vmatmul.mubr.bf16.gmra.mrb[60].mxu0 %v3792_v40 }
 0x34f   : > { %2811 = vmatprep.mubr.bf16.mxu0 %v3793_v43  ;;  %v2059_v43 = vpop.permute.xlu0 %2058 }
 0x356   : > { %2812 = vmatmul.mubr.bf16.gmra.mrb[64].mxu0 %v3795_v44 }
 0x357   : > { %2821 = vmatprep.mubr.bf16.mxu0 %v3796_v41 }
 0x35e   : > { %2822 = vmatmul.mubr.bf16.gmra.mrb[68].mxu0 %v3798_v47 }
 0x35f   : > { %2831 = vmatprep.mubr.bf16.mxu0 %v3799_v52 }
 0x366   : > { %2832 = vmatmul.mubr.bf16.gmra.mrb[72].mxu0 %v3801_v50  ;;  %v2064_v50 = vpop.permute.xlu1 %2063 }
 0x367   : > { %2841 = vmatprep.mubr.bf16.mxu0 %v3802_v49 }
 0x36e   : > { %2842 = vmatmul.mubr.bf16.gmra.mrb[76].mxu0 %v3804_v30 }
 0x36f   : > { %2851 = vmatprep.mubr.bf16.mxu0 %v3805_v56 }
 0x376   : > { %2852 = vmatmul.mubr.bf16.gmra.mrb[80].mxu0 %v3807_v1 }
 0x377   : > { %2861 = vmatprep.mubr.bf16.mxu0 %v3808_v45 }
 0x37e   : > { %2862 = vmatmul.mubr.bf16.gmra.mrb[84].mxu0 %v3810_v54 }
 0x37f   : > { %2871 = vmatprep.mubr.bf16.mxu0 %v3811_v32 }
 0x386   : > { %2872 = vmatmul.mubr.bf16.gmra.mrb[88].mxu0 %v3813_v57 }
 0x387   : > { %2881 = vmatprep.mubr.bf16.mxu0 %v3814_v59 }
 0x38e   : > { %2882 = vmatmul.mubr.bf16.gmra.mrb[92].mxu0 %v3816_v5 }
 0x3e9   : > { %v2733_v63 = vpop.f32.mrb[32].mxu0 }
 0x3ea   : > { %v3507_v0 = vadd.f32 %v2733_v63, %v2029_v60  ;;  %v2735_v2 = vpop.f32.mrb[33].mxu0 }
 0x3eb   : > { %v3508_v6 = vadd.f32 %v2735_v2, %v2029_v60  ;;  %v2737_v10 = vpop.f32.mrb[34].mxu0  ;;  %v2069_v60 = vpop.permute.xlu0 %2068 }
 0x3ec   : > { %v3509_v46 = vadd.f32 %v2737_v10, %v2034_v4  ;;  %v2739_v42 = vpop.f32.mrb[35].mxu0  ;;  %v2892_v8 = vmax.f32 %v3507_v0, 0.0 }
 0x3ed   : > { %v3510_v13 = vadd.f32 %v2739_v42, %v2034_v4  ;;  %v2893_v14 = vmax.f32 %v3508_v6, 0.0  ;;  %v2074_v6 = vpop.permute.xlu1 %2073 }
 0x3ee   : > { %v2894_v53 = vmax.f32 %v3509_v46, 0.0 }
 0x3ef   : > { %v2895_v16 = vmax.f32 %v3510_v13, 0.0 }
 0x3f0   : > { %v2964_v3 = vpack.c.bf16 %v2894_v53, %v2892_v8 }
 0x3f1   : > { %v2965_v9 = vpack.c.bf16 %v2895_v16, %v2893_v14  ;;  %v2743_v18 = vpop.f32.mrb[36].mxu0 }
 0x3f2   : > { %v3511_v48 = vadd.f32 %v2743_v18, %v2039_v17  ;;  %v2745_v58 = vpop.f32.mrb[37].mxu0 }
 0x3f3   : > { %v3512_v21 = vadd.f32 %v2745_v58, %v2039_v17  ;;  %v2747_v19 = vpop.f32.mrb[38].mxu0  ;;  %3084 = vmatprep.subr.bf16.mxu1 %v2965_v9  ;;  %v2079_v17 = vpop.permute.xlu0 %2078 }
 0x3f4   : > { %v3513_v23 = vadd.f32 %v2747_v19, %v2044_v20  ;;  %v2749_v7 = vpop.f32.mrb[39].mxu0  ;;  %3085 = vmatpush1.bf16.msra.mxu1 %v2964_v3  ;;  %v2896_v26 = vmax.f32 %v3511_v48, 0.0 }
 0x3f5   : > { %v3514_v24 = vadd.f32 %v2749_v7, %v2044_v20  ;;  %v2897_v11 = vmax.f32 %v3512_v21, 0.0  ;;  %v2084_v20 = vpop.permute.xlu1 %2083 }
 0x3f6   : > { %v2898_v12 = vmax.f32 %v3513_v23, 0.0 }
 0x3f7   : > { %v2899_v15 = vmax.f32 %v3514_v24, 0.0 }
 0x3f8   : > { %v2966_v27 = vpack.c.bf16 %v2898_v12, %v2896_v26 }
 0x3f9   : > { %v2967_v31 = vpack.c.bf16 %v2899_v15, %v2897_v11  ;;  %v2753_v33 = vpop.f32.mrb[40].mxu0 }
 0x3fa   : > { %v3515_v35 = vadd.f32 %v2753_v33, %v2049_v29  ;;  %v2755_v51 = vpop.f32.mrb[41].mxu0 }
 0x3fb   : > { %v3516_v61 = vadd.f32 %v2755_v51, %v2049_v29  ;;  %v2757_v28 = vpop.f32.mrb[42].mxu0  ;;  %3086 = vmatprep.subr.bf16.mxu1 %v2967_v31  ;;  %v2089_v29 = vpop.permute.xlu0 %2088 }
 0x3fc   : > { %v3517_v36 = vadd.f32 %v2757_v28, %v2054_v22  ;;  %v2759_v37 = vpop.f32.mrb[43].mxu0  ;;  %3087 = vmatpush1.bf16.msra.mxu1 %v2966_v27  ;;  %v2900_v34 = vmax.f32 %v3515_v35, 0.0 }
 0x3fd   : > { %v3518_v25 = vadd.f32 %v2759_v37, %v2054_v22  ;;  %v2901_v62 = vmax.f32 %v3516_v61, 0.0  ;;  %v2094_v22 = vpop.permute.xlu1 %2093 }
 0x3fe   : > { %v2902_v38 = vmax.f32 %v3517_v36, 0.0 }
 0x3ff   : > { %v2903_v39 = vmax.f32 %v3518_v25, 0.0 }
 0x400   : > { %v2968_v40 = vpack.c.bf16 %v2902_v38, %v2900_v34 }
 0x401   : > { %v2969_v44 = vpack.c.bf16 %v2903_v39, %v2901_v62  ;;  %v2763_v41 = vpop.f32.mrb[44].mxu0 }
 0x402   : > { %v3519_v47 = vadd.f32 %v2763_v41, %v2059_v43  ;;  %v2765_v52 = vpop.f32.mrb[45].mxu0 }
 0x403   : > { %v3520_v49 = vadd.f32 %v2765_v52, %v2059_v43  ;;  %v2767_v30 = vpop.f32.mrb[46].mxu0  ;;  %3088 = vmatprep.subr.bf16.mxu1 %v2969_v44  ;;  %v2099_v43 = vpop.permute.xlu0 %2098 }
 0x404   : > { %v3521_v56 = vadd.f32 %v2767_v30, %v2064_v50  ;;  %v2769_v1 = vpop.f32.mrb[47].mxu0  ;;  %3089 = vmatpush1.bf16.msra.mxu1 %v2968_v40  ;;  %v2904_v54 = vmax.f32 %v3519_v47, 0.0 }
 0x405   : > { %v3522_v45 = vadd.f32 %v2769_v1, %v2064_v50  ;;  %v2905_v57 = vmax.f32 %v3520_v49, 0.0  ;;  %v2104_v50 = vpop.permute.xlu1 %2103 }
 0x406   : > { %v2906_v32 = vmax.f32 %v3521_v56, 0.0 }
 0x407   : > { %v2907_v59 = vmax.f32 %v3522_v45, 0.0 }
 0x408   : > { %v2970_v5 = vpack.c.bf16 %v2906_v32, %v2904_v54 }
 0x409   : > { %v2971_v63 = vpack.c.bf16 %v2907_v59, %v2905_v57  ;;  %v2773_v0 = vpop.f32.mrb[48].mxu0 }
 0x40a   : > { %v3523_v2 = vadd.f32 %v2773_v0, %v2069_v60  ;;  %v2775_v4 = vpop.f32.mrb[49].mxu0 }
 0x40b   : > { %v3524_v10 = vadd.f32 %v2775_v4, %v2069_v60  ;;  %v2777_v46 = vpop.f32.mrb[50].mxu0  ;;  %3090 = vmatprep.subr.bf16.mxu1 %v2971_v63  ;;  %v2109_v60 = vpop.permute.xlu0 %2108 }
 0x40c   : > { %v3525_v42 = vadd.f32 %v2777_v46, %v2074_v6  ;;  %v2779_v55 = vpop.f32.mrb[51].mxu0  ;;  %3091 = vmatpush1.bf16.msra.mxu1 %v2970_v5  ;;  %v2908_v8 = vmax.f32 %v3523_v2, 0.0 }
 0x40d   : > { %v3526_v13 = vadd.f32 %v2779_v55, %v2074_v6  ;;  %v2909_v14 = vmax.f32 %v3524_v10, 0.0  ;;  %v2114_v6 = vpop.permute.xlu1 %2113 }
 0x40e   : > { %v2910_v53 = vmax.f32 %v3525_v42, 0.0 }
 0x40f   : > { %v2911_v16 = vmax.f32 %v3526_v13, 0.0 }
 0x410   : > { %v2972_v3 = vpack.c.bf16 %v2910_v53, %v2908_v8 }
 0x411   : > { %v2973_v9 = vpack.c.bf16 %v2911_v16, %v2909_v14  ;;  %v2783_v18 = vpop.f32.mrb[52].mxu0 }
 0x412   : > { %v3527_v48 = vadd.f32 %v2783_v18, %v2079_v17  ;;  %v2785_v58 = vpop.f32.mrb[53].mxu0 }
 0x413   : > { %v3528_v21 = vadd.f32 %v2785_v58, %v2079_v17  ;;  %v2787_v19 = vpop.f32.mrb[54].mxu0  ;;  %3092 = vmatprep.subr.bf16.mxu1 %v2973_v9  ;;  %v2119_v17 = vpop.permute.xlu0 %2118 }
 0x414   : > { %v3529_v23 = vadd.f32 %v2787_v19, %v2084_v20  ;;  %v2789_v7 = vpop.f32.mrb[55].mxu0  ;;  %3093 = vmatpush1.bf16.msra.mxu1 %v2972_v3  ;;  %v2912_v26 = vmax.f32 %v3527_v48, 0.0 }
 0x415   : > { %v3530_v24 = vadd.f32 %v2789_v7, %v2084_v20  ;;  %v2913_v11 = vmax.f32 %v3528_v21, 0.0  ;;  %v2124_v20 = vpop.permute.xlu1 %2123 }
 0x416   : > { %v2914_v12 = vmax.f32 %v3529_v23, 0.0 }
 0x417   : > { %v2915_v15 = vmax.f32 %v3530_v24, 0.0 }
 0x418   : > { %v2974_v27 = vpack.c.bf16 %v2914_v12, %v2912_v26 }
 0x419   : > { %v2975_v31 = vpack.c.bf16 %v2915_v15, %v2913_v11  ;;  %v2793_v33 = vpop.f32.mrb[56].mxu0 }
 0x41a   : > { %v3531_v35 = vadd.f32 %v2793_v33, %v2089_v29  ;;  %v2795_v51 = vpop.f32.mrb[57].mxu0 }
 0x41b   : > { %v3532_v61 = vadd.f32 %v2795_v51, %v2089_v29  ;;  %v2797_v28 = vpop.f32.mrb[58].mxu0  ;;  %3094 = vmatprep.subr.bf16.mxu1 %v2975_v31  ;;  %v2129_v29 = vpop.permute.xlu0 %2128 }
 0x41c   : > { %v3533_v36 = vadd.f32 %v2797_v28, %v2094_v22  ;;  %v2799_v37 = vpop.f32.mrb[59].mxu0  ;;  %3095 = vmatpush1.bf16.msra.mxu1 %v2974_v27  ;;  %v2916_v34 = vmax.f32 %v3531_v35, 0.0 }
 0x41d   : > { %v3534_v25 = vadd.f32 %v2799_v37, %v2094_v22  ;;  %v2917_v62 = vmax.f32 %v3532_v61, 0.0  ;;  %v2134_v22 = vpop.permute.xlu1 %2133 }
 0x41e   : > { %v2918_v38 = vmax.f32 %v3533_v36, 0.0 }
 0x41f   : > { %v2919_v39 = vmax.f32 %v3534_v25, 0.0 }
 0x420   : > { %v2976_v40 = vpack.c.bf16 %v2918_v38, %v2916_v34 }
 0x421   : > { %v2977_v44 = vpack.c.bf16 %v2919_v39, %v2917_v62  ;;  %v2803_v41 = vpop.f32.mrb[60].mxu0 }
 0x422   : > { %v3535_v47 = vadd.f32 %v2803_v41, %v2099_v43  ;;  %v2805_v52 = vpop.f32.mrb[61].mxu0 }
 0x423   : > { %v3536_v49 = vadd.f32 %v2805_v52, %v2099_v43  ;;  %v2807_v30 = vpop.f32.mrb[62].mxu0  ;;  %3096 = vmatprep.subr.bf16.mxu1 %v2977_v44  ;;  %v2139_v43 = vpop.permute.xlu0 %2138 }
 0x424   : > { %v3537_v56 = vadd.f32 %v2807_v30, %v2104_v50  ;;  %v2809_v1 = vpop.f32.mrb[63].mxu0  ;;  %3097 = vmatpush1.bf16.msra.mxu1 %v2976_v40  ;;  %v2920_v54 = vmax.f32 %v3535_v47, 0.0 }
 0x425   : > { %v3538_v45 = vadd.f32 %v2809_v1, %v2104_v50  ;;  %v2921_v57 = vmax.f32 %v3536_v49, 0.0  ;;  %v2144_v50 = vpop.permute.xlu1 %2143 }
 0x426   : > { %v2922_v32 = vmax.f32 %v3537_v56, 0.0 }
 0x427   : > { %v2923_v59 = vmax.f32 %v3538_v45, 0.0 }
 0x428   : > { %v2978_v5 = vpack.c.bf16 %v2922_v32, %v2920_v54 }
 0x429   : > { %v2979_v63 = vpack.c.bf16 %v2923_v59, %v2921_v57  ;;  %v2813_v0 = vpop.f32.mrb[64].mxu0 }
 0x42a   : > { %v3539_v2 = vadd.f32 %v2813_v0, %v2109_v60  ;;  %v2815_v4 = vpop.f32.mrb[65].mxu0 }
 0x42b   : > { %v3540_v10 = vadd.f32 %v2815_v4, %v2109_v60  ;;  %v2817_v46 = vpop.f32.mrb[66].mxu0  ;;  %3098 = vmatprep.subr.bf16.mxu1 %v2979_v63  ;;  %v2149_v60 = vpop.permute.xlu0 %2148 }
 0x42c   : > { %v3541_v42 = vadd.f32 %v2817_v46, %v2114_v6  ;;  %v2819_v55 = vpop.f32.mrb[67].mxu0  ;;  %3099 = vmatpush1.bf16.msra.mxu1 %v2978_v5  ;;  %v2924_v8 = vmax.f32 %v3539_v2, 0.0 }
 0x42d   : > { %v3542_v13 = vadd.f32 %v2819_v55, %v2114_v6  ;;  %v2925_v14 = vmax.f32 %v3540_v10, 0.0  ;;  %v2154_v6 = vpop.permute.xlu1 %2153 }
 0x42e   : > { %v2926_v53 = vmax.f32 %v3541_v42, 0.0 }
 0x42f   : > { %v2927_v16 = vmax.f32 %v3542_v13, 0.0 }
 0x430   : > { %v2980_v3 = vpack.c.bf16 %v2926_v53, %v2924_v8 }
 0x431   : > { %v2981_v9 = vpack.c.bf16 %v2927_v16, %v2925_v14  ;;  %v2823_v18 = vpop.f32.mrb[68].mxu0 }
 0x432   : > { %v3543_v48 = vadd.f32 %v2823_v18, %v2119_v17  ;;  %v2825_v58 = vpop.f32.mrb[69].mxu0 }
 0x433   : > { %v3544_v21 = vadd.f32 %v2825_v58, %v2119_v17  ;;  %v2827_v19 = vpop.f32.mrb[70].mxu0  ;;  %3100 = vmatprep.subr.bf16.mxu1 %v2981_v9  ;;  %v2159_v17 = vpop.permute.xlu0 %2158 }
 0x434   : > { %v3545_v23 = vadd.f32 %v2827_v19, %v2124_v20  ;;  %v2829_v7 = vpop.f32.mrb[71].mxu0  ;;  %3101 = vmatpush1.bf16.msra.mxu1 %v2980_v3  ;;  %v2928_v26 = vmax.f32 %v3543_v48, 0.0 }
 0x435   : > { %v3546_v24 = vadd.f32 %v2829_v7, %v2124_v20  ;;  %v2929_v11 = vmax.f32 %v3544_v21, 0.0  ;;  %v2164_v20 = vpop.permute.xlu1 %2163 }
 0x436   : > { %v2930_v12 = vmax.f32 %v3545_v23, 0.0 }
 0x437   : > { %v2931_v15 = vmax.f32 %v3546_v24, 0.0 }
 0x438   : > { %v2982_v27 = vpack.c.bf16 %v2930_v12, %v2928_v26 }
 0x439   : > { %v2983_v31 = vpack.c.bf16 %v2931_v15, %v2929_v11  ;;  %v2833_v33 = vpop.f32.mrb[72].mxu0 }
 0x43a   : > { %v3547_v35 = vadd.f32 %v2833_v33, %v2129_v29  ;;  %v2835_v51 = vpop.f32.mrb[73].mxu0 }
 0x43b   : > { %v3548_v61 = vadd.f32 %v2835_v51, %v2129_v29  ;;  %v2837_v28 = vpop.f32.mrb[74].mxu0  ;;  %3102 = vmatprep.subr.bf16.mxu1 %v2983_v31  ;;  %v2169_v29 = vpop.permute.xlu0 %2168 }
 0x43c   : > { %v3549_v36 = vadd.f32 %v2837_v28, %v2134_v22  ;;  %v2839_v37 = vpop.f32.mrb[75].mxu0  ;;  %3103 = vmatpush1.bf16.msra.mxu1 %v2982_v27  ;;  %v2932_v34 = vmax.f32 %v3547_v35, 0.0 }
 0x43d   : > { %v3550_v25 = vadd.f32 %v2839_v37, %v2134_v22  ;;  %v2933_v62 = vmax.f32 %v3548_v61, 0.0  ;;  %v2174_v22 = vpop.permute.xlu1 %2173 }
 0x43e   : > { %v2934_v38 = vmax.f32 %v3549_v36, 0.0 }
 0x43f   : > { %v2935_v39 = vmax.f32 %v3550_v25, 0.0 }
 0x440   : > { %v2984_v40 = vpack.c.bf16 %v2934_v38, %v2932_v34 }
 0x441   : > { %v2985_v44 = vpack.c.bf16 %v2935_v39, %v2933_v62  ;;  %v2843_v41 = vpop.f32.mrb[76].mxu0 }
 0x442   : > { %v3551_v47 = vadd.f32 %v2843_v41, %v2139_v43  ;;  %v2845_v52 = vpop.f32.mrb[77].mxu0 }
 0x443   : > { %v3552_v49 = vadd.f32 %v2845_v52, %v2139_v43  ;;  %v2847_v30 = vpop.f32.mrb[78].mxu0  ;;  %3104 = vmatprep.subr.bf16.mxu1 %v2985_v44  ;;  %v2179_v43 = vpop.permute.xlu0 %2178 }
 0x444   : > { %v3553_v56 = vadd.f32 %v2847_v30, %v2144_v50  ;;  %v2849_v1 = vpop.f32.mrb[79].mxu0  ;;  %3105 = vmatpush1.bf16.msra.mxu1 %v2984_v40  ;;  %v2936_v54 = vmax.f32 %v3551_v47, 0.0 }
 0x445   : > { %v3554_v45 = vadd.f32 %v2849_v1, %v2144_v50  ;;  %v2937_v57 = vmax.f32 %v3552_v49, 0.0  ;;  %v2184_v50 = vpop.permute.xlu1 %2183 }
 0x446   : > { %v2938_v32 = vmax.f32 %v3553_v56, 0.0 }
 0x447   : > { %v2939_v59 = vmax.f32 %v3554_v45, 0.0 }
 0x448   : > { %v2986_v5 = vpack.c.bf16 %v2938_v32, %v2936_v54 }
 0x449   : > { %v2987_v63 = vpack.c.bf16 %v2939_v59, %v2937_v57  ;;  %v2853_v0 = vpop.f32.mrb[80].mxu0 }
 0x44a   : > { %v3555_v2 = vadd.f32 %v2853_v0, %v2149_v60  ;;  %v2855_v4 = vpop.f32.mrb[81].mxu0  ;;  %v3820_v0 = vld [vmem:[%s4960_s7 + $0x14] ss:$8 sps:$4 sm:$0xff]  }
 0x44b   : > { %v3556_v10 = vadd.f32 %v2855_v4, %v2149_v60  ;;  %v2857_v46 = vpop.f32.mrb[82].mxu0  ;;  %3106 = vmatprep.subr.bf16.mxu1 %v2987_v63  ;;  %v3817_v63 = vld [vmem:[%s4960_s7] ss:$8 sps:$4 sm:$0xff]   ;;  %v3823_v4 = vld [vmem:[%s4960_s7 + $0x24] ss:$8 sps:$4 sm:$0xff]  }
 0x44c   : > { %v3557_v42 = vadd.f32 %v2857_v46, %v2154_v6  ;;  %v2859_v55 = vpop.f32.mrb[83].mxu0  ;;  %3107 = vmatpush1.bf16.msra.mxu1 %v2986_v5  ;;  %v2940_v8 = vmax.f32 %v3555_v2, 0.0  ;;  %v3822_v2 = vld [vmem:[%s4960_s7 + $0x10] ss:$8 sps:$4 sm:$0xff]  }
 0x44d   : > { %v3558_v13 = vadd.f32 %v2859_v55, %v2154_v6  ;;  %v2941_v14 = vmax.f32 %v3556_v10, 0.0  ;;  %v3825_v6 = vld [vmem:[%s4960_s7 + $0x20] ss:$8 sps:$4 sm:$0xff]   ;;  %v3826_v10 = vld [vmem:[%s4960_s7 + $0x34] ss:$8 sps:$4 sm:$0xff]   ;;  %v3007_v55 = vpop.permute.xlu0 %3006 }
 0x44e   : > { %v2942_v53 = vmax.f32 %v3557_v42, 0.0  ;;  %v3828_v46 = vld [vmem:[%s4960_s7 + $0x30] ss:$8 sps:$4 sm:$0xff]   ;;  %v3012_v42 = vpop.permute.xlu1 %3011 }
 0x44f   : > { %v2943_v16 = vmax.f32 %v3558_v13, 0.0 }
 0x450   : > { %v2988_v3 = vpack.c.bf16 %v2942_v53, %v2940_v8 }
 0x451   : > { %v2989_v9 = vpack.c.bf16 %v2943_v16, %v2941_v14  ;;  %v2863_v18 = vpop.f32.mrb[84].mxu0  ;;  %v3017_v8 = vpop.permute.xlu0 %3016 }
 0x452   : > { %v3559_v48 = vadd.f32 %v2863_v18, %v2159_v17  ;;  %v2865_v58 = vpop.f32.mrb[85].mxu0  ;;  %v3022_v13 = vpop.permute.xlu1 %3021 }
 0x453   : > { %v3560_v21 = vadd.f32 %v2865_v58, %v2159_v17  ;;  %v2867_v19 = vpop.f32.mrb[86].mxu0  ;;  %3108 = vmatprep.subr.bf16.mxu1 %v2989_v9 }
 0x454   : > { %v3561_v23 = vadd.f32 %v2867_v19, %v2164_v20  ;;  %v2869_v7 = vpop.f32.mrb[87].mxu0  ;;  %3109 = vmatpush1.bf16.msra.mxu1 %v2988_v3  ;;  %v2944_v26 = vmax.f32 %v3559_v48, 0.0 }
 0x455   : > { %v3562_v24 = vadd.f32 %v2869_v7, %v2164_v20  ;;  %v2945_v11 = vmax.f32 %v3560_v21, 0.0  ;;  %v3184_v14 = vpop.permute.xlu0 %3183 }
 0x456   : > { %v2946_v12 = vmax.f32 %v3561_v23, 0.0  ;;  %v3189_v53 = vpop.permute.xlu1 %3188 }
 0x457   : > { %v2947_v15 = vmax.f32 %v3562_v24, 0.0 }
 0x458   : > { %v2990_v27 = vpack.c.bf16 %v2946_v12, %v2944_v26 }
 0x459   : > { %v2991_v31 = vpack.c.bf16 %v2947_v15, %v2945_v11  ;;  %v2873_v33 = vpop.f32.mrb[88].mxu0  ;;  %v3027_v19 = vpop.permute.xlu0 %3026 }
 0x45a   : > { %v3563_v35 = vadd.f32 %v2873_v33, %v2169_v29  ;;  %v2875_v51 = vpop.f32.mrb[89].mxu0  ;;  %v3194_v48 = vpop.permute.xlu1 %3193 }
 0x45b   : > { %v3564_v61 = vadd.f32 %v2875_v51, %v2169_v29  ;;  %v2877_v28 = vpop.f32.mrb[90].mxu0  ;;  %3110 = vmatprep.subr.bf16.mxu1 %v2991_v31 }
 0x45c   : > { %v3565_v36 = vadd.f32 %v2877_v28, %v2174_v22  ;;  %v2879_v37 = vpop.f32.mrb[91].mxu0  ;;  %3111 = vmatpush1.bf16.msra.mxu1 %v2990_v27  ;;  %v2948_v34 = vmax.f32 %v3563_v35, 0.0 }
 0x45d   : > { %v3566_v25 = vadd.f32 %v2879_v37, %v2174_v22  ;;  %v2949_v62 = vmax.f32 %v3564_v61, 0.0  ;;  %v3032_v22 = vpop.permute.xlu0 %3031 }
 0x45e   : > { %v2950_v38 = vmax.f32 %v3565_v36, 0.0  ;;  %v3199_v31 = vpop.permute.xlu1 %3198 }
 0x45f   : > { %v2951_v39 = vmax.f32 %v3566_v25, 0.0 }
 0x460   : > { %v2992_v40 = vpack.c.bf16 %v2950_v38, %v2948_v34 }
 0x461   : > { %v2993_v44 = vpack.c.bf16 %v2951_v39, %v2949_v62  ;;  %v2883_v41 = vpop.f32.mrb[92].mxu0 }
 0x462   : > { %v3567_v47 = vadd.f32 %v2883_v41, %v2179_v43  ;;  %v2885_v52 = vpop.f32.mrb[93].mxu0  ;;  %v3204_v41 = vpop.permute.xlu1 %3203 }
 0x463   : > { %v3568_v49 = vadd.f32 %v2885_v52, %v2179_v43  ;;  %v2887_v30 = vpop.f32.mrb[94].mxu0  ;;  %3112 = vmatprep.subr.bf16.mxu1 %v2993_v44 }
 0x464   : > { %v3569_v56 = vadd.f32 %v2887_v30, %v2184_v50  ;;  %v2889_v1 = vpop.f32.mrb[95].mxu0  ;;  %3113 = vmatpush1.bf16.msra.mxu1 %v2992_v40  ;;  %v2952_v54 = vmax.f32 %v3567_v47, 0.0 }
 0x465   : > { %v3570_v45 = vadd.f32 %v2889_v1, %v2184_v50  ;;  %v2953_v57 = vmax.f32 %v3568_v49, 0.0  ;;  %v3037_v50 = vpop.permute.xlu0 %3036 }
 0x466   : > { %v2954_v32 = vmax.f32 %v3569_v56, 0.0 }
 0x467   : > { %v2955_v59 = vmax.f32 %v3570_v45, 0.0 }
 0x468   : > { %v2994_v5 = vpack.c.bf16 %v2954_v32, %v2952_v54 }
 0x469   : > { %v2995_v60 = vpack.c.bf16 %v2955_v59, %v2953_v57 }
 0x46b   : > { %3114 = vmatprep.subr.bf16.mxu1 %v2995_v60 }
 0x46c   : > { %3115 = vmatpush1.bf16.msra.mxu1 %v2994_v5 }
 0x46f   : > { %3117 = vmatmul.mubr.bf16.vlgmr.msra.gmra.mrb[128].mxu1 %v3817_v63 }
 0x470   : > { %3126 = vmatprep.mubr.bf16.mxu1 %v3820_v0 }
 0x477   : > { %3127 = vmatmul.mubr.bf16.gmra.mrb[132].mxu1 %v3822_v2 }
 0x478   : > { %3136 = vmatprep.mubr.bf16.mxu1 %v3823_v4 }
 0x47f   : > { %3137 = vmatmul.mubr.bf16.gmra.mrb[136].mxu1 %v3825_v6 }
 0x480   : > { %3146 = vmatprep.mubr.bf16.mxu1 %v3826_v10  ;;  %v3209_v10 = vpop.permute.xlu1 %3208 }
 0x487   : > { %3147 = vmatmul.mubr.bf16.gmra.mrb[140].mxu1 %v3828_v46  ;;  %v3042_v46 = vpop.permute.xlu0 %3041 }
 0x542   : > { %v3118_v16 = vpop.f32.mrb[128].mxu1 }
 0x543   : > { %v3119_v3 = vadd.f32 %v3118_v16, %v3007_v55  ;;  %v3120_v17 = vpop.f32.mrb[129].mxu1 }
 0x544   : > { %v3121_v9 = vadd.f32 %v3120_v17, %v3007_v55  ;;  %v3122_v18 = vpop.f32.mrb[130].mxu1 }
 0x545   : > { %v3157_v58 = vmax.f32 %v3119_v3, 0.0  ;;  %v3123_v20 = vadd.f32 %v3122_v18, %v3012_v42  ;;  %v3124_v21 = vpop.f32.mrb[131].mxu1 }
 0x546   : > { %v3158_v23 = vmax.f32 %v3121_v9, 0.0  ;;  %v3125_v7 = vadd.f32 %v3124_v21, %v3012_v42 }
 0x547   : > { %v3159_v24 = vmax.f32 %v3123_v20, 0.0  ;;  %v3221_v12 = vmul.f32 %v3184_v14, %v3157_v58 }
 0x548   : > { %v3160_v26 = vmax.f32 %v3125_v7, 0.0  ;;  %v3222_v15 = vmul.f32 %v3184_v14, %v3158_v23  ;;  %v3214_v23 = vpop.permute.xlu0 %3213 }
 0x549   : > { %v3223_v11 = vmul.f32 %v3189_v53, %v3159_v24 }
 0x54a   : > { %v3224_v27 = vmul.f32 %v3189_v53, %v3160_v26  ;;  %v3128_v29 = vpop.f32.mrb[132].mxu1 }
 0x54b   : > { %v3237_v33 = vadd.f32 %v3223_v11, %v3221_v12  ;;  %v3129_v35 = vadd.f32 %v3128_v29, %v3017_v8  ;;  %v3130_v51 = vpop.f32.mrb[133].mxu1  ;;  %v3219_v11 = vpop.permute.xlu1 %3218 }
 0x54c   : > { %v3250_v61 = vadd.f32 %v3224_v27, %v3222_v15  ;;  %v3131_v28 = vadd.f32 %v3130_v51, %v3017_v8  ;;  %v3132_v36 = vpop.f32.mrb[134].mxu1  ;;  %v3269_v51 = vlaneseq }
 0x54d   : > { %v3161_v37 = vmax.f32 %v3129_v35, 0.0  ;;  %v3133_v25 = vadd.f32 %v3132_v36, %v3022_v13  ;;  %v3134_v34 = vpop.f32.mrb[135].mxu1 }
 0x54e   : > { %v3162_v38 = vmax.f32 %v3131_v28, 0.0  ;;  %v3135_v62 = vadd.f32 %v3134_v34, %v3022_v13  ;;  %vm3295_vm3 = vcmp.lt.s32.totalorder %v3269_v51, 256 }
 0x54f   : > { %v3225_v39 = vmul.f32 %v3194_v48, %v3161_v37  ;;  %v3163_v40 = vmax.f32 %v3133_v25, 0.0  ;;  %v3270_v37 = vshrl.u32 %v3269_v51, 7 }
 0x550   : > { %v3226_v43 = vmul.f32 %v3194_v48, %v3162_v38  ;;  %v3164_v44 = vmax.f32 %v3135_v62, 0.0  ;;  %v3895_v62 = vmov 1966171168  }
 0x551   : > { %v3238_v47 = vadd.f32 %v3237_v33, %v3225_v39  ;;  %v3227_v52 = vmul.f32 %v3199_v31, %v3163_v40  ;;  %v3279_v39 = vunpack.c.l.s4 %v3895_v62 }
 0x552   : > { %v3251_v49 = vadd.f32 %v3250_v61, %v3226_v43  ;;  %v3228_v30 = vmul.f32 %v3199_v31, %v3164_v44  ;;  %v3138_v56 = vpop.f32.mrb[136].mxu1  ;;  %v3271_v43 = vsub.s32 0, %v3270_v37 }
 0x553   : > { %v3239_v1 = vadd.f32 %v3238_v47, %v3227_v52  ;;  %v3139_v45 = vadd.f32 %v3138_v56, %v3027_v19  ;;  %v3140_v54 = vpop.f32.mrb[137].mxu1 }
 0x554   : > { %v3252_v32 = vadd.f32 %v3251_v49, %v3228_v30  ;;  %v3141_v57 = vadd.f32 %v3140_v54, %v3027_v19  ;;  %v3142_v59 = vpop.f32.mrb[138].mxu1 }
 0x555   : > { %v3165_v5 = vmax.f32 %v3139_v45, 0.0  ;;  %v3143_v60 = vadd.f32 %v3142_v59, %v3032_v22  ;;  %v3144_v63 = vpop.f32.mrb[139].mxu1 }
 0x556   : > { %v3166_v0 = vmax.f32 %v3141_v57, 0.0  ;;  %v3145_v2 = vadd.f32 %v3144_v63, %v3032_v22 }
 0x557   : > { %v3229_v4 = vmul.f32 %v3204_v41, %v3165_v5  ;;  %v3167_v6 = vmax.f32 %v3143_v60, 0.0 }
 0x558   : > { %v3230_v42 = vmul.f32 %v3204_v41, %v3166_v0  ;;  %v3168_v55 = vmax.f32 %v3145_v2, 0.0  ;;  %v3267_v41 = vpop.permute.xlu0 %3266 }
 0x559   : > { %v3240_v13 = vadd.f32 %v3239_v1, %v3229_v4  ;;  %v3231_v8 = vmul.f32 %v3209_v10, %v3167_v6  ;;  %v3272_v30 = vrot.slane %v3267_v41, %v3271_v43 }
 0x55a   : > { %v3253_v53 = vadd.f32 %v3252_v32, %v3230_v42  ;;  %v3232_v14 = vmul.f32 %v3209_v10, %v3168_v55  ;;  %v3148_v16 = vpop.f32.mrb[140].mxu1 }
 0x55b   : > { %v3241_v3 = vadd.f32 %v3240_v13, %v3231_v8  ;;  %v3149_v17 = vadd.f32 %v3148_v16, %v3037_v50  ;;  %v3150_v9 = vpop.f32.mrb[141].mxu1 }
 0x55c   : > { %v3254_v18 = vadd.f32 %v3253_v53, %v3232_v14  ;;  %v3151_v48 = vadd.f32 %v3150_v9, %v3037_v50  ;;  %v3152_v58 = vpop.f32.mrb[142].mxu1  ;;  %v3280_v50 = vunpack.c.0.s8 %v3279_v39 }
 0x55d   : > { %v3169_v20 = vmax.f32 %v3149_v17, 0.0  ;;  %v3153_v21 = vadd.f32 %v3152_v58, %v3042_v46  ;;  %v3154_v19 = vpop.f32.mrb[143].mxu1 }
 0x55e   : > { %v3170_v7 = vmax.f32 %v3151_v48, 0.0  ;;  %v3155_v24 = vadd.f32 %v3154_v19, %v3042_v46  ;;  %v3283_v54 = vsub.s32 %v3280_v50, %v3270_v37 }
 0x55f   : > { %v3233_v26 = vmul.f32 %v3214_v23, %v3169_v20  ;;  %v3171_v12 = vmax.f32 %v3153_v21, 0.0 }
 0x560   : > { %v3234_v15 = vmul.f32 %v3214_v23, %v3170_v7  ;;  %v3172_v27 = vmax.f32 %v3155_v24, 0.0 }
 0x561   : > { %v3242_v29 = vadd.f32 %v3241_v3, %v3233_v26  ;;  %v3235_v31 = vmul.f32 %v3219_v11, %v3171_v12 }
 0x562   : > { %v3255_v33 = vadd.f32 %v3254_v18, %v3234_v15  ;;  %v3236_v35 = vmul.f32 %v3219_v11, %v3172_v27 }
 0x563   : > { %v3243_v22 = vadd.f32 %v3242_v29, %v3235_v31 }
 0x564   : > { %v3256_v61 = vadd.f32 %v3255_v33, %v3236_v35 }
 0x565   : > { %v3244_v28 = vrot.slane %v3243_v22, 4 }
 0x566   : > { %v3257_v36 = vrot.slane %v3256_v61, 4 }
 0x567   : > { %v3245_v25 = vadd.f32 %v3244_v28, %v3243_v22 }
 0x568   : > { %v3258_v34 = vadd.f32 %v3257_v36, %v3256_v61 }
 0x569   : > { %v3246_v38 = vrot.slane %v3245_v25, 2 }
 0x56a   : > { %v3259_v40 = vrot.slane %v3258_v34, 2 }
 0x56b   : > { %v3247_v44 = vadd.f32 %v3246_v38, %v3245_v25 }
 0x56c   : > { %v3260_v47 = vadd.f32 %v3259_v40, %v3258_v34 }
 0x56d   : > { %v3248_v52 = vrot.slane %v3247_v44, 1 }
 0x56e   : > { %v3261_v49 = vrot.slane %v3260_v47, 1 }
 0x56f   : > { %v3249_v56 = vadd.f32 %v3248_v52, %v3247_v44 }
 0x570   : > { %v3262_v1 = vadd.f32 %v3261_v49, %v3260_v47 }
 0x571   : > { %v3273_v45 = vadd.f32 %v3272_v30, %v3249_v56 }
 0x572   : > { %v3274_v32 = vadd.f32 %v3272_v30, %v3262_v1 }
 0x574   : > { %v3277_v57 = vcombine.low %v3273_v45, %v3274_v32 }
 0x576   : > { %v3284_v59 = vrot.slane %v3277_v57, %v3283_v54 }
 0x578   : > { %v3291_v5 = vrot.slane %v3284_v59, %v3283_v54 }
 0x57a   : > { %3297 = vst.msk [vmem:[%s382_s16] sm:$0x3] %vm3295_vm3, %v3291_v5 }
 0x57b   : > { %3842 = shalt.err (!%p3839_p3)
}
 0x57c   : > { %s3843_s12 = scalar_lea.hbm %s4911_s23, 32  ;;  %s3847_s15 = scalar_lea.hbm %s4964_s11, 64 }
 0x57d   : > { %p3844_p4 = scmp.ne.s32.totalorder %s4911_s23, %s3843_s12  ;;  %p3848_p9 = scmp.lt.u32.totalorder %s4911_s23, %s4964_s11 }
 0x57e   : > { %p3849_p10 = scmp.lt.u32.totalorder %s3847_s15, %s3843_s12  ;;  %p3851_p12 = scmp.lt.u32.totalorder %s3843_s12, %s4911_s23 }
 0x57f   : > { %p3845_p7 = pnand %p3844_p4, %p3998_p5 }
 0x580   : > { %p3850_p11 = por %p3849_p10, %p3848_p9 }
 0x581   : > { %p3846_p8 = pneg %p3845_p7 }
 0x582   : > { %p3852_p13 = por %p3851_p12, %p3850_p11 }
 0x584   : > { %p3853_p0 = pnand %p3852_p13, %p3846_p8 }
 0x586   : > { %3856 = shalt.err (!%p3853_p0)
}
 0x587   : > { %3635 = dma.vmem_to_hbm [thread:$0]  (%p3998_p5), %s4913_s17, 32, %s4911_s23, %s3299_s26  }
 0x588 PF: > { %p3641_p1 = scmp.ge.s32.totalorder %s3891_s22, 2  ;;  %s3325_s25 = sand.u32 1, %s3879_s19  }
 0x589   : > { %s3326_s30 = scalar_lea.sflag [#allocation4], %s3325_s25 }
 0x58a   : > { %p3638_p2 = pnand %p3641_p1, %p4002_p6 }
 0x58c   : > { %3874 = dma.done.wait (!%p3638_p2), %s3326_s30, 32  }
 0x58d   : > { %3876 = vsyncadd (!%p3638_p2), %s3326_s30, 4294967264  ;;  %p23_p3 = scmp.ge.s32.totalorder %s3985_s24, 4   ;;  %s4967_s19 = smov %s3883_s20 }
 0x58e   : > { %s4968_s20 = smov %s3887_s21  ;;  %s4969_s21 = smov %s3996_s27 }
 0x58f   : > { %s4970_s22 = smov %s3985_s24  ;;  %25 = sbr.rel (!%p23_p3) target bundleno = 6 (0x6), region = 99 }
 0x596   :  { %3331 = vsyncpa [#allocation4], 1 }
 0x597   :  { %3333 = vsyncpa [#allocation4 + $0x1], 1 }

</bundles_post_ra>
